<compile_context>
chip_gen: v5e
topology: v5e:2x2
jax: 0.10.0
libtpu: 0.0.40
codegen_flags: <defaults>
</compile_context>

<pallas_src>
import functools
import math

import numpy as np
import jax
import jax.numpy as jnp
from jax import lax
from jax.experimental import pallas as pl
from jax.experimental.pallas import tpu as pltpu


# ----------------------------------------------------------------------------
# Parameter setup (glue): RBJ biquad coefficients used by pyloudnorm K-weighting
# ----------------------------------------------------------------------------
def _rbj_high_shelf(G, Q, fc, fs):
    A = 10.0 ** (G / 40.0)
    w0 = 2.0 * math.pi * (fc / fs)
    alpha = math.sin(w0) / (2.0 * Q)
    b0 = A * ((A + 1) + (A - 1) * math.cos(w0) + 2 * math.sqrt(A) * alpha)
    b1 = -2 * A * ((A - 1) + (A + 1) * math.cos(w0))
    b2 = A * ((A + 1) + (A - 1) * math.cos(w0) - 2 * math.sqrt(A) * alpha)
    a0 = (A + 1) - (A - 1) * math.cos(w0) + 2 * math.sqrt(A) * alpha
    a1 = 2 * ((A - 1) - (A + 1) * math.cos(w0))
    a2 = (A + 1) - (A - 1) * math.cos(w0) - 2 * math.sqrt(A) * alpha
    return np.array([b0, b1, b2, a0, a1, a2], dtype=np.float64) / a0


def _rbj_high_pass(G, Q, fc, fs):
    w0 = 2.0 * math.pi * (fc / fs)
    alpha = math.sin(w0) / (2.0 * Q)
    b0 = (1 + math.cos(w0)) / 2
    b1 = -(1 + math.cos(w0))
    b2 = (1 + math.cos(w0)) / 2
    a0 = 1 + alpha
    a1 = -2 * math.cos(w0)
    a2 = 1 - alpha
    return np.array([b0, b1, b2, a0, a1, a2], dtype=np.float64) / a0


# ----------------------------------------------------------------------------
# Kernel 1: fused K-weighting biquad cascade + per-hop (100ms) energy sums.
#   * x is streamed from HBM hop-by-hop (double-buffered manual DMA).
#   * The serial IIR loop is unrolled by 8; filter states stay in registers.
#   * Output: per-hop sums of y^2, shape (num_hops, C).  y never touches HBM.
# ----------------------------------------------------------------------------
def _kweight_energy_kernel(coef_ref, x_hbm, e_ref, buf0, buf1, sem,
                           *, hop_len, num_hops, valid_len, mask_needed):
    C = e_ref.shape[1]
    b0a, b1a, b2a = coef_ref[0, 0], coef_ref[0, 1], coef_ref[0, 2]
    a1a, a2a = coef_ref[0, 4], coef_ref[0, 5]
    b0b, b1b, b2b = coef_ref[1, 0], coef_ref[1, 1], coef_ref[1, 2]
    a1b, a2b = coef_ref[1, 4], coef_ref[1, 5]

    n8 = hop_len // 8              # full 8-sample chunks per hop (static)
    rem = hop_len - 8 * n8         # leftover samples per hop (static, < 8)

    def copy_hop(h, buf, sem_slot):
        return pltpu.make_async_copy(
            x_hbm.at[pl.ds(h * hop_len, hop_len), :], buf, sem.at[sem_slot])

    def biquads(xt, s):
        x1a, x2a, y1a, y2a, x1b, x2b, y1b, y2b = s
        ya = b0a * xt + b1a * x1a + b2a * x2a - a1a * y1a - a2a * y2a   # high shelf
        yb = b0b * ya + b1b * x1b + b2b * x2b - a1b * y1b - a2b * y2b   # high pass
        return yb, (xt, x1a, ya, y1a, ya, x1b, yb, y1b)

    def process_hop(h, buf, state):
        base = h * hop_len
        acc0 = jnp.zeros((1, C), jnp.float32)

        def chunk(j, carry):
            s, acc = carry[:8], carry[8]
            off = pl.multiple_of(j * 8, 8)
            xc = buf[pl.ds(off, 8), :]                       # one (8, C) load / 8 samples
            if mask_needed:
                gi = base + off + lax.broadcasted_iota(jnp.int32, (8, 1), 0)
                m = (gi < valid_len).astype(jnp.float32)     # (8, 1)
            for i in range(8):                               # unrolled; states in vregs
                yb, s = biquads(xc[i:i + 1, :], s)
                e = yb * yb
                if mask_needed:
                    e = e * m[i:i + 1, :]
                acc = acc + e
            return s + (acc,)

        carry = lax.fori_loop(0, n8, chunk, tuple(state) + (acc0,))

        if rem:                                              # static tail (< 8 samples)
            def tail(i, carry):
                s, acc = carry[:8], carry[8]
                t = n8 * 8 + i
                yb, s = biquads(buf[pl.ds(t, 1), :], s)
                e = yb * yb
                if mask_needed:
                    e = e * (base + t < valid_len).astype(jnp.float32)
                return s + (acc + e,)
            carry = lax.fori_loop(0, rem, tail, carry)

        e_ref[pl.ds(h, 1), :] = carry[8]
        return carry[:8]

    # prologue: fill both buffers
    copy_hop(0, buf0, 0).start()
    if num_hops > 1:
        copy_hop(1, buf1, 1).start()

    zero = jnp.zeros((1, C), jnp.float32)
    npairs = num_hops // 2

    def pair_body(k, state):
        h0 = 2 * k
        copy_hop(h0, buf0, 0).wait()
        state = process_hop(h0, buf0, state)

        @pl.when(h0 + 2 < num_hops)
        def _():
            copy_hop(h0 + 2, buf0, 0).start()

        copy_hop(h0 + 1, buf1, 1).wait()
        state = process_hop(h0 + 1, buf1, state)

        @pl.when(h0 + 3 < num_hops)
        def _():
            copy_hop(h0 + 3, buf1, 1).start()

        return state

    state = lax.fori_loop(0, npairs, pair_body, (zero,) * 8)

    if num_hops % 2:                                         # static epilogue: last hop
        h_last = num_hops - 1
        copy_hop(h_last, buf0, 0).wait()
        process_hop(h_last, buf0, state)


# ----------------------------------------------------------------------------
# Kernel 2: apply loudness-normalization gain (tiled, lane-dense, memory-bound)
# ----------------------------------------------------------------------------
def _apply_gain_kernel(gain_ref, x_ref, o_ref):
    o_ref[...] = x_ref[...] * gain_ref[0]


_MAX_GAIN_TILE = 1 << 17   # samples per block (multiple of 128); ~1 MB/buffer at C=2


# ----------------------------------------------------------------------------
# Module
# ----------------------------------------------------------------------------
class Loudness:
    """Normalizes (channels, length) audio to `target` LUFS using BS.1770-4."""

    def __init__(self, sampling_rate: int, target: float):
        self.sampling_rate = sampling_rate
        self.target = target
        hs = _rbj_high_shelf(4.0, 1.0 / math.sqrt(2.0), 1500.0, sampling_rate)
        hp = _rbj_high_pass(0.0, 0.5, 38.0, sampling_rate)
        # deterministic "parameters" of the module (normalized biquad coefficients)
        self.coefs = jnp.asarray(np.stack([hs, hp]), dtype=jnp.float32)   # (2, 6)
        self._forward = jax.jit(self._forward_impl)

    def __call__(self, x: jnp.ndarray) -> jnp.ndarray:
        return self._forward(x)

    def _forward_impl(self, x: jnp.ndarray) -> jnp.ndarray:
        C, L = x.shape
        rate = self.sampling_rate
        T_g, step = 0.4, 0.25                        # 400ms blocks, 75% overlap
        T = L / rate
        num_blocks = int(round((T - T_g) / (T_g * step))) + 1
        assert num_blocks >= 1, "signal shorter than one 400ms gating block"
        num_hops = num_blocks + 3                    # 100ms hops; block j = hops j..j+3

        # hop boundaries, computed with pyloudnorm's exact float expressions
        bounds = [int(T_g * (j * step) * rate) for j in range(num_hops + 1)]
        hop_len = bounds[1] - bounds[0]
        assert hop_len >= 8 and all(bounds[j] == j * hop_len
                                    for j in range(num_hops + 1)), \
            "non-uniform gating hops (sampling_rate not a multiple of 10) unsupported"
        # TODO(synk): support non-uniform hop boundaries (e.g. 11025 Hz) via per-hop SMEM offsets.

        x = x.astype(jnp.float32)
        needed = num_hops * hop_len                  # samples touched by the gating blocks
        valid_len = min(L, needed)                   # pyloudnorm truncates the last block at L
        mask_needed = needed > L

        # Time-major view for the IIR kernel (dynamic sublane addressing in-kernel);
        # zero-pad only if the last gating block runs past the signal end (its padded
        # samples' energy is masked off inside the kernel).
        x_tc = x.T                                   # (L, C)
        if mask_needed:
            x_tc = jnp.pad(x_tc, ((0, needed - L), (0, 0)))

        # --- Kernel 1: fused K-weighting filter + per-hop energy sums ---
        hop_e = pl.pallas_call(
            functools.partial(_kweight_energy_kernel, hop_len=hop_len,
                              num_hops=num_hops, valid_len=valid_len,
                              mask_needed=mask_needed),
            out_shape=jax.ShapeDtypeStruct((num_hops, C), jnp.float32),
            grid=(1,),
            in_specs=[pl.BlockSpec(memory_space=pltpu.MemorySpace.SMEM),
                      pl.BlockSpec(memory_space=pl.ANY)],
            out_specs=pl.BlockSpec((num_hops, C), lambda i: (0, 0)),
            scratch_shapes=[pltpu.VMEM((hop_len, C), jnp.float32),
                            pltpu.VMEM((hop_len, C), jnp.float32),
                            pltpu.SemaphoreType.DMA((2,))],
            compiler_params=pltpu.CompilerParams(
                dimension_semantics=("arbitrary",)),
        )(self.coefs, x_tc)

        # --- Gating + LUFS: tiny math on num_blocks values (plain JAX glue) ---
        inv_tg_fs = 1.0 / (T_g * rate)
        nB = num_blocks
        z = (hop_e[0:nB] + hop_e[1:nB + 1] + hop_e[2:nB + 2] + hop_e[3:nB + 3]) \
            * inv_tg_fs                                                    # (nB, C)
        G = jnp.asarray([1.0, 1.0, 1.0, 1.41, 1.41], jnp.float32)[:C]
        l = -0.691 + 10.0 * jnp.log10(jnp.sum(z * G[None, :], axis=1))     # (nB,)
        gamma_a = -70.0
        m1 = l >= gamma_a
        c1 = jnp.maximum(jnp.sum(m1), 1).astype(jnp.float32)
        z_avg1 = jnp.sum(z * m1[:, None].astype(z.dtype), axis=0) / c1
        gamma_r = -0.691 + 10.0 * jnp.log10(jnp.sum(G * z_avg1)) - 10.0
        m2 = (l > gamma_r) & (l > gamma_a)
        c2 = jnp.maximum(jnp.sum(m2), 1).astype(jnp.float32)
        z_avg2 = jnp.sum(z * m2[:, None].astype(z.dtype), axis=0) / c2
        loudness = -0.691 + 10.0 * jnp.log10(jnp.sum(G * z_avg2))

        # loudness == -inf  => return x unchanged (gain = 1)
        gain = jnp.where(jnp.isfinite(loudness),
                         10.0 ** ((self.target - loudness) / 20.0),
                         1.0).astype(jnp.float32).reshape(1)

        # --- Kernel 2: apply gain, tiled/pipelined over time ---
        tile_l = L if L <= _MAX_GAIN_TILE else _MAX_GAIN_TILE
        grid_n = pl.cdiv(L, tile_l)
        out = pl.pallas_call(
            _apply_gain_kernel,
            out_shape=jax.ShapeDtypeStruct((C, L), jnp.float32),
            grid=(grid_n,),
            in_specs=[pl.BlockSpec(memory_space=pltpu.MemorySpace.SMEM),
                      pl.BlockSpec((C, tile_l), lambda i: (0, i))],
            out_specs=pl.BlockSpec((C, tile_l), lambda i: (0, i)),
            compiler_params=pltpu.CompilerParams(
                dimension_semantics=("parallel",)),
        )(gain, x)
        return out


# ----------------------------------------------------------------------------
# Pure numpy reference (float64, pyloudnorm-style) for correctness check
# ----------------------------------------------------------------------------
def _reference_numpy(x_np, coefs_np, rate, target):
    data = x_np.T.astype(np.float64)                 # (L, C)
    for (b0, b1, b2, _, a1, a2) in coefs_np:
        out = np.zeros_like(data)
        Cn = data.shape[1]
        x1 = np.zeros(Cn); x2 = np.zeros(Cn); y1 = np.zeros(Cn); y2 = np.zeros(Cn)
        for t in range(data.shape[0]):
            xt = data[t]
            yt = b0 * xt + b1 * x1 + b2 * x2 - a1 * y1 - a2 * y2
            out[t] = yt
            x2, x1 = x1, xt
            y2, y1 = y1, yt
        data = out
    T_g, step = 0.4, 0.25
    L, C = data.shape
    T = L / rate
    nB = int(round((T - T_g) / (T_g * step))) + 1
    z = np.zeros((nB, C))
    for j in range(nB):
        lo = int(T_g * (j * step) * rate)
        hi = int(T_g * (j * step + 1) * rate)
        z[j] = np.sum(data[lo:hi] ** 2, axis=0) / (T_g * rate)
    G = np.array([1.0, 1.0, 1.0, 1.41, 1.41])[:C]
    with np.errstate(divide="ignore"):
        l = -0.691 + 10 * np.log10((z * G).sum(axis=1))
    J1 = l >= -70.0
    if J1.sum() == 0:
        loudness = -np.inf
    else:
        z1 = z[J1].mean(axis=0)
        gamma_r = -0.691 + 10 * np.log10((G * z1).sum()) - 10.0
        J2 = (l > gamma_r) & (l > -70.0)
        if J2.sum() == 0:
            loudness = -np.inf
        else:
            z2 = z[J2].mean(axis=0)
            loudness = -0.691 + 10 * np.log10((G * z2).sum())
    if not np.isfinite(loudness):
        return x_np
    gain = 10.0 ** ((target - loudness) / 20.0)
    return (x_np * gain).astype(np.float32)


if __name__ == "__main__":
    sampling_rate = 4000
    target = -20.0
    C, L = 2, 4000                                   # 1 second of stereo audio @ 4 kHz

    key = jax.random.PRNGKey(0)
    x = 0.1 * jax.random.normal(key, (C, L), dtype=jnp.float32)
    x_np = np.asarray(x)                             # snapshot before running

    mod = Loudness(sampling_rate, target)
    out = jax.block_until_ready(mod(x))

    ref = _reference_numpy(x_np, np.asarray(mod.coefs, dtype=np.float64),
                           sampling_rate, target)
    assert out.shape == x.shape and out.dtype == jnp.float32
    err = float(np.max(np.abs(np.asarray(out) - ref)))
    assert np.allclose(np.asarray(out), ref, rtol=5e-3, atol=1e-5), err
    print("KERNEL_OK")
</pallas_src>

<mosaic_0001>
module attributes {stable_mosaic.version = 11 : i64} {
  func.func @_kweight_energy_kernel(%arg0: i32, %arg1: memref<2x6xf32, #tpu.memory_space<smem>>, %arg2: memref<4000x2xf32, #tpu.memory_space<any>>, %arg3: memref<10x2xf32, #tpu.memory_space<vmem>>, %arg4: memref<400x2xf32, #tpu.memory_space<vmem>>, %arg5: memref<400x2xf32, #tpu.memory_space<vmem>>, %arg6: memref<2x!tpu.dma_semaphore, #tpu.memory_space<semaphore_mem>>) attributes {dimension_semantics = [#tpu.dimension_semantics<arbitrary>], iteration_bounds = array<i64: 1>, scalar_prefetch = 0 : i64, scratch_operands = 3 : i64, tpu.core_type = #tpu.core_type<tc>, window_params = [{transform_indices = @transform_0, window_bounds = array<i64: 2, 6>}, {}, {pipeline_mode = #tpu.pipeline_mode<synchronous>, transform_indices = @transform_2, window_bounds = array<i64: 10, 2>}]} {
    %c0 = arith.constant 0 : index
    %c0_0 = arith.constant 0 : index
    %0 = memref.load %arg1[%c0, %c0_0] : memref<2x6xf32, #tpu.memory_space<smem>>
    %c0_1 = arith.constant 0 : index
    %c1 = arith.constant 1 : index
    %1 = memref.load %arg1[%c0_1, %c1] : memref<2x6xf32, #tpu.memory_space<smem>>
    %c0_2 = arith.constant 0 : index
    %c2 = arith.constant 2 : index
    %2 = memref.load %arg1[%c0_2, %c2] : memref<2x6xf32, #tpu.memory_space<smem>>
    %c0_3 = arith.constant 0 : index
    %c4 = arith.constant 4 : index
    %3 = memref.load %arg1[%c0_3, %c4] : memref<2x6xf32, #tpu.memory_space<smem>>
    %c0_4 = arith.constant 0 : index
    %c5 = arith.constant 5 : index
    %4 = memref.load %arg1[%c0_4, %c5] : memref<2x6xf32, #tpu.memory_space<smem>>
    %c1_5 = arith.constant 1 : index
    %c0_6 = arith.constant 0 : index
    %5 = memref.load %arg1[%c1_5, %c0_6] : memref<2x6xf32, #tpu.memory_space<smem>>
    %c1_7 = arith.constant 1 : index
    %c1_8 = arith.constant 1 : index
    %6 = memref.load %arg1[%c1_7, %c1_8] : memref<2x6xf32, #tpu.memory_space<smem>>
    %c1_9 = arith.constant 1 : index
    %c2_10 = arith.constant 2 : index
    %7 = memref.load %arg1[%c1_9, %c2_10] : memref<2x6xf32, #tpu.memory_space<smem>>
    %c1_11 = arith.constant 1 : index
    %c4_12 = arith.constant 4 : index
    %8 = memref.load %arg1[%c1_11, %c4_12] : memref<2x6xf32, #tpu.memory_space<smem>>
    %c1_13 = arith.constant 1 : index
    %c5_14 = arith.constant 5 : index
    %9 = memref.load %arg1[%c1_13, %c5_14] : memref<2x6xf32, #tpu.memory_space<smem>>
    %c0_i32 = arith.constant 0 : i32
    %c0_i32_15 = arith.constant 0 : i32
    %c0_i32_16 = arith.constant 0 : i32
    %10 = tpu.memref_slice %arg2[%c0_i32_15, %c0_i32_16] : memref<4000x2xf32, #tpu.memory_space<any>> -> memref<400x2xf32, #tpu.memory_space<any>>
    %11 = tpu.memref_slice %arg6[%c0_i32] : memref<2x!tpu.dma_semaphore, #tpu.memory_space<semaphore_mem>> -> memref<1x!tpu.dma_semaphore, #tpu.memory_space<semaphore_mem>>
    %12 = tpu.memref_squeeze %11 : memref<1x!tpu.dma_semaphore, #tpu.memory_space<semaphore_mem>> -> memref<!tpu.dma_semaphore, #tpu.memory_space<semaphore_mem>>
    tpu.enqueue_dma source(%10 : memref<400x2xf32, #tpu.memory_space<any>>) target(%arg4 : memref<400x2xf32, #tpu.memory_space<vmem>>) target_semaphore(%12 : memref<!tpu.dma_semaphore, #tpu.memory_space<semaphore_mem>>)
    %c1_i32 = arith.constant 1 : i32
    %c400_i32 = arith.constant 400 : i32
    %c0_i32_17 = arith.constant 0 : i32
    %13 = tpu.memref_slice %arg2[%c400_i32, %c0_i32_17] : memref<4000x2xf32, #tpu.memory_space<any>> -> memref<400x2xf32, #tpu.memory_space<any>>
    %14 = tpu.memref_slice %arg6[%c1_i32] : memref<2x!tpu.dma_semaphore, #tpu.memory_space<semaphore_mem>> -> memref<1x!tpu.dma_semaphore, #tpu.memory_space<semaphore_mem>>
    %15 = tpu.memref_squeeze %14 : memref<1x!tpu.dma_semaphore, #tpu.memory_space<semaphore_mem>> -> memref<!tpu.dma_semaphore, #tpu.memory_space<semaphore_mem>>
    tpu.enqueue_dma source(%13 : memref<400x2xf32, #tpu.memory_space<any>>) target(%arg5 : memref<400x2xf32, #tpu.memory_space<vmem>>) target_semaphore(%15 : memref<!tpu.dma_semaphore, #tpu.memory_space<semaphore_mem>>)
    %cst = arith.constant 0.000000e+00 : f32
    %16 = vector.broadcast %cst : f32 to vector<1x2xf32>
    %c0_i32_18 = arith.constant 0 : i32
    %c5_i32 = arith.constant 5 : i32
    %17 = arith.addi %c0_i32_18, %c5_i32 : i32
    %c1_i32_19 = arith.constant 1 : i32
    %18:8 = scf.for %arg7 = %c0_i32_18 to %17 step %c1_i32_19 iter_args(%arg8 = %16, %arg9 = %16, %arg10 = %16, %arg11 = %16, %arg12 = %16, %arg13 = %16, %arg14 = %16, %arg15 = %16) -> (vector<1x2xf32>, vector<1x2xf32>, vector<1x2xf32>, vector<1x2xf32>, vector<1x2xf32>, vector<1x2xf32>, vector<1x2xf32>, vector<1x2xf32>)  : i32 {
      %c2_i32 = arith.constant 2 : i32
      %19 = arith.muli %c2_i32, %arg7 : i32
      %c400_i32_21 = arith.constant 400 : i32
      %20 = arith.muli %19, %c400_i32_21 : i32
      %c0_i32_22 = arith.constant 0 : i32
      %c0_i32_23 = arith.constant 0 : i32
      %21 = tpu.memref_slice %arg2[%20, %c0_i32_23] : memref<4000x2xf32, #tpu.memory_space<any>> -> memref<400x2xf32, #tpu.memory_space<any>>
      %22 = tpu.memref_slice %arg6[%c0_i32_22] : memref<2x!tpu.dma_semaphore, #tpu.memory_space<semaphore_mem>> -> memref<1x!tpu.dma_semaphore, #tpu.memory_space<semaphore_mem>>
      %23 = tpu.memref_squeeze %22 : memref<1x!tpu.dma_semaphore, #tpu.memory_space<semaphore_mem>> -> memref<!tpu.dma_semaphore, #tpu.memory_space<semaphore_mem>>
      tpu.wait_dma2 semaphore(%23 : memref<!tpu.dma_semaphore, #tpu.memory_space<semaphore_mem>>) src(%21 : memref<400x2xf32, #tpu.memory_space<any>>) dst(%arg4 : memref<400x2xf32, #tpu.memory_space<vmem>>)
      %cst_24 = arith.constant 0.000000e+00 : f32
      %24 = vector.broadcast %cst_24 : f32 to vector<1x2xf32>
      %c0_i32_25 = arith.constant 0 : i32
      %c50_i32 = arith.constant 50 : i32
      %25 = arith.addi %c0_i32_25, %c50_i32 : i32
      %c1_i32_26 = arith.constant 1 : i32
      %26:9 = scf.for %arg16 = %c0_i32_25 to %25 step %c1_i32_26 iter_args(%arg17 = %arg8, %arg18 = %arg9, %arg19 = %arg10, %arg20 = %arg11, %arg21 = %arg12, %arg22 = %arg13, %arg23 = %arg14, %arg24 = %arg15, %arg25 = %24) -> (vector<1x2xf32>, vector<1x2xf32>, vector<1x2xf32>, vector<1x2xf32>, vector<1x2xf32>, vector<1x2xf32>, vector<1x2xf32>, vector<1x2xf32>, vector<1x2xf32>)  : i32 {
        %c8_i32 = arith.constant 8 : i32
        %48 = arith.muli %arg16, %c8_i32 : i32
        %49 = tpu.assume_multiple %48, 8 : i32
        %50 = arith.index_cast %49 : i32 to index
        %c0_44 = arith.constant 0 : index
        %51 = vector.load %arg4[%50, %c0_44] : memref<400x2xf32, #tpu.memory_space<vmem>>, vector<8x2xf32>
        %52 = vector.extract_strided_slice %51 {offsets = [0, 0], sizes = [1, 2], strides = [1, 1]} : vector<8x2xf32> to vector<1x2xf32>
        %53 = vector.broadcast %0 : f32 to vector<1x2xf32>
        %54 = arith.mulf %53, %52 : vector<1x2xf32>
        %55 = vector.broadcast %1 : f32 to vector<1x2xf32>
        %56 = arith.mulf %55, %arg17 : vector<1x2xf32>
        %57 = arith.addf %54, %56 : vector<1x2xf32>
        %58 = vector.broadcast %2 : f32 to vector<1x2xf32>
        %59 = arith.mulf %58, %arg18 : vector<1x2xf32>
        %60 = arith.addf %57, %59 : vector<1x2xf32>
        %61 = vector.broadcast %3 : f32 to vector<1x2xf32>
        %62 = arith.mulf %61, %arg19 : vector<1x2xf32>
        %63 = arith.subf %60, %62 : vector<1x2xf32>
        %64 = vector.broadcast %4 : f32 to vector<1x2xf32>
        %65 = arith.mulf %64, %arg20 : vector<1x2xf32>
        %66 = arith.subf %63, %65 : vector<1x2xf32>
        %67 = vector.broadcast %5 : f32 to vector<1x2xf32>
        %68 = arith.mulf %67, %66 : vector<1x2xf32>
        %69 = vector.broadcast %6 : f32 to vector<1x2xf32>
        %70 = arith.mulf %69, %arg21 : vector<1x2xf32>
        %71 = arith.addf %68, %70 : vector<1x2xf32>
        %72 = vector.broadcast %7 : f32 to vector<1x2xf32>
        %73 = arith.mulf %72, %arg22 : vector<1x2xf32>
        %74 = arith.addf %71, %73 : vector<1x2xf32>
        %75 = vector.broadcast %8 : f32 to vector<1x2xf32>
        %76 = arith.mulf %75, %arg23 : vector<1x2xf32>
        %77 = arith.subf %74, %76 : vector<1x2xf32>
        %78 = vector.broadcast %9 : f32 to vector<1x2xf32>
        %79 = arith.mulf %78, %arg24 : vector<1x2xf32>
        %80 = arith.subf %77, %79 : vector<1x2xf32>
        %81 = arith.mulf %80, %80 : vector<1x2xf32>
        %82 = arith.addf %arg25, %81 : vector<1x2xf32>
        %83 = vector.extract_strided_slice %51 {offsets = [1, 0], sizes = [1, 2], strides = [1, 1]} : vector<8x2xf32> to vector<1x2xf32>
        %84 = vector.broadcast %0 : f32 to vector<1x2xf32>
        %85 = arith.mulf %84, %83 : vector<1x2xf32>
        %86 = vector.broadcast %1 : f32 to vector<1x2xf32>
        %87 = arith.mulf %86, %52 : vector<1x2xf32>
        %88 = arith.addf %85, %87 : vector<1x2xf32>
        %89 = vector.broadcast %2 : f32 to vector<1x2xf32>
        %90 = arith.mulf %89, %arg17 : vector<1x2xf32>
        %91 = arith.addf %88, %90 : vector<1x2xf32>
        %92 = vector.broadcast %3 : f32 to vector<1x2xf32>
        %93 = arith.mulf %92, %66 : vector<1x2xf32>
        %94 = arith.subf %91, %93 : vector<1x2xf32>
        %95 = vector.broadcast %4 : f32 to vector<1x2xf32>
        %96 = arith.mulf %95, %arg19 : vector<1x2xf32>
        %97 = arith.subf %94, %96 : vector<1x2xf32>
        %98 = vector.broadcast %5 : f32 to vector<1x2xf32>
        %99 = arith.mulf %98, %97 : vector<1x2xf32>
        %100 = vector.broadcast %6 : f32 to vector<1x2xf32>
        %101 = arith.mulf %100, %66 : vector<1x2xf32>
        %102 = arith.addf %99, %101 : vector<1x2xf32>
        %103 = vector.broadcast %7 : f32 to vector<1x2xf32>
        %104 = arith.mulf %103, %arg21 : vector<1x2xf32>
        %105 = arith.addf %102, %104 : vector<1x2xf32>
        %106 = vector.broadcast %8 : f32 to vector<1x2xf32>
        %107 = arith.mulf %106, %80 : vector<1x2xf32>
        %108 = arith.subf %105, %107 : vector<1x2xf32>
        %109 = vector.broadcast %9 : f32 to vector<1x2xf32>
        %110 = arith.mulf %109, %arg23 : vector<1x2xf32>
        %111 = arith.subf %108, %110 : vector<1x2xf32>
        %112 = arith.mulf %111, %111 : vector<1x2xf32>
        %113 = arith.addf %82, %112 : vector<1x2xf32>
        %114 = vector.extract_strided_slice %51 {offsets = [2, 0], sizes = [1, 2], strides = [1, 1]} : vector<8x2xf32> to vector<1x2xf32>
        %115 = vector.broadcast %0 : f32 to vector<1x2xf32>
        %116 = arith.mulf %115, %114 : vector<1x2xf32>
        %117 = vector.broadcast %1 : f32 to vector<1x2xf32>
        %118 = arith.mulf %117, %83 : vector<1x2xf32>
        %119 = arith.addf %116, %118 : vector<1x2xf32>
        %120 = vector.broadcast %2 : f32 to vector<1x2xf32>
        %121 = arith.mulf %120, %52 : vector<1x2xf32>
        %122 = arith.addf %119, %121 : vector<1x2xf32>
        %123 = vector.broadcast %3 : f32 to vector<1x2xf32>
        %124 = arith.mulf %123, %97 : vector<1x2xf32>
        %125 = arith.subf %122, %124 : vector<1x2xf32>
        %126 = vector.broadcast %4 : f32 to vector<1x2xf32>
        %127 = arith.mulf %126, %66 : vector<1x2xf32>
        %128 = arith.subf %125, %127 : vector<1x2xf32>
        %129 = vector.broadcast %5 : f32 to vector<1x2xf32>
        %130 = arith.mulf %129, %128 : vector<1x2xf32>
        %131 = vector.broadcast %6 : f32 to vector<1x2xf32>
        %132 = arith.mulf %131, %97 : vector<1x2xf32>
        %133 = arith.addf %130, %132 : vector<1x2xf32>
        %134 = vector.broadcast %7 : f32 to vector<1x2xf32>
        %135 = arith.mulf %134, %66 : vector<1x2xf32>
        %136 = arith.addf %133, %135 : vector<1x2xf32>
        %137 = vector.broadcast %8 : f32 to vector<1x2xf32>
        %138 = arith.mulf %137, %111 : vector<1x2xf32>
        %139 = arith.subf %136, %138 : vector<1x2xf32>
        %140 = vector.broadcast %9 : f32 to vector<1x2xf32>
        %141 = arith.mulf %140, %80 : vector<1x2xf32>
        %142 = arith.subf %139, %141 : vector<1x2xf32>
        %143 = arith.mulf %142, %142 : vector<1x2xf32>
        %144 = arith.addf %113, %143 : vector<1x2xf32>
        %145 = vector.extract_strided_slice %51 {offsets = [3, 0], sizes = [1, 2], strides = [1, 1]} : vector<8x2xf32> to vector<1x2xf32>
        %146 = vector.broadcast %0 : f32 to vector<1x2xf32>
        %147 = arith.mulf %146, %145 : vector<1x2xf32>
        %148 = vector.broadcast %1 : f32 to vector<1x2xf32>
        %149 = arith.mulf %148, %114 : vector<1x2xf32>
        %150 = arith.addf %147, %149 : vector<1x2xf32>
        %151 = vector.broadcast %2 : f32 to vector<1x2xf32>
        %152 = arith.mulf %151, %83 : vector<1x2xf32>
        %153 = arith.addf %150, %152 : vector<1x2xf32>
        %154 = vector.broadcast %3 : f32 to vector<1x2xf32>
        %155 = arith.mulf %154, %128 : vector<1x2xf32>
        %156 = arith.subf %153, %155 : vector<1x2xf32>
        %157 = vector.broadcast %4 : f32 to vector<1x2xf32>
        %158 = arith.mulf %157, %97 : vector<1x2xf32>
        %159 = arith.subf %156, %158 : vector<1x2xf32>
        %160 = vector.broadcast %5 : f32 to vector<1x2xf32>
        %161 = arith.mulf %160, %159 : vector<1x2xf32>
        %162 = vector.broadcast %6 : f32 to vector<1x2xf32>
        %163 = arith.mulf %162, %128 : vector<1x2xf32>
        %164 = arith.addf %161, %163 : vector<1x2xf32>
        %165 = vector.broadcast %7 : f32 to vector<1x2xf32>
        %166 = arith.mulf %165, %97 : vector<1x2xf32>
        %167 = arith.addf %164, %166 : vector<1x2xf32>
        %168 = vector.broadcast %8 : f32 to vector<1x2xf32>
        %169 = arith.mulf %168, %142 : vector<1x2xf32>
        %170 = arith.subf %167, %169 : vector<1x2xf32>
        %171 = vector.broadcast %9 : f32 to vector<1x2xf32>
        %172 = arith.mulf %171, %111 : vector<1x2xf32>
        %173 = arith.subf %170, %172 : vector<1x2xf32>
        %174 = arith.mulf %173, %173 : vector<1x2xf32>
        %175 = arith.addf %144, %174 : vector<1x2xf32>
        %176 = vector.extract_strided_slice %51 {offsets = [4, 0], sizes = [1, 2], strides = [1, 1]} : vector<8x2xf32> to vector<1x2xf32>
        %177 = vector.broadcast %0 : f32 to vector<1x2xf32>
        %178 = arith.mulf %177, %176 : vector<1x2xf32>
        %179 = vector.broadcast %1 : f32 to vector<1x2xf32>
        %180 = arith.mulf %179, %145 : vector<1x2xf32>
        %181 = arith.addf %178, %180 : vector<1x2xf32>
        %182 = vector.broadcast %2 : f32 to vector<1x2xf32>
        %183 = arith.mulf %182, %114 : vector<1x2xf32>
        %184 = arith.addf %181, %183 : vector<1x2xf32>
        %185 = vector.broadcast %3 : f32 to vector<1x2xf32>
        %186 = arith.mulf %185, %159 : vector<1x2xf32>
        %187 = arith.subf %184, %186 : vector<1x2xf32>
        %188 = vector.broadcast %4 : f32 to vector<1x2xf32>
        %189 = arith.mulf %188, %128 : vector<1x2xf32>
        %190 = arith.subf %187, %189 : vector<1x2xf32>
        %191 = vector.broadcast %5 : f32 to vector<1x2xf32>
        %192 = arith.mulf %191, %190 : vector<1x2xf32>
        %193 = vector.broadcast %6 : f32 to vector<1x2xf32>
        %194 = arith.mulf %193, %159 : vector<1x2xf32>
        %195 = arith.addf %192, %194 : vector<1x2xf32>
        %196 = vector.broadcast %7 : f32 to vector<1x2xf32>
        %197 = arith.mulf %196, %128 : vector<1x2xf32>
        %198 = arith.addf %195, %197 : vector<1x2xf32>
        %199 = vector.broadcast %8 : f32 to vector<1x2xf32>
        %200 = arith.mulf %199, %173 : vector<1x2xf32>
        %201 = arith.subf %198, %200 : vector<1x2xf32>
        %202 = vector.broadcast %9 : f32 to vector<1x2xf32>
        %203 = arith.mulf %202, %142 : vector<1x2xf32>
        %204 = arith.subf %201, %203 : vector<1x2xf32>
        %205 = arith.mulf %204, %204 : vector<1x2xf32>
        %206 = arith.addf %175, %205 : vector<1x2xf32>
        %207 = vector.extract_strided_slice %51 {offsets = [5, 0], sizes = [1, 2], strides = [1, 1]} : vector<8x2xf32> to vector<1x2xf32>
        %208 = vector.broadcast %0 : f32 to vector<1x2xf32>
        %209 = arith.mulf %208, %207 : vector<1x2xf32>
        %210 = vector.broadcast %1 : f32 to vector<1x2xf32>
        %211 = arith.mulf %210, %176 : vector<1x2xf32>
        %212 = arith.addf %209, %211 : vector<1x2xf32>
        %213 = vector.broadcast %2 : f32 to vector<1x2xf32>
        %214 = arith.mulf %213, %145 : vector<1x2xf32>
        %215 = arith.addf %212, %214 : vector<1x2xf32>
        %216 = vector.broadcast %3 : f32 to vector<1x2xf32>
        %217 = arith.mulf %216, %190 : vector<1x2xf32>
        %218 = arith.subf %215, %217 : vector<1x2xf32>
        %219 = vector.broadcast %4 : f32 to vector<1x2xf32>
        %220 = arith.mulf %219, %159 : vector<1x2xf32>
        %221 = arith.subf %218, %220 : vector<1x2xf32>
        %222 = vector.broadcast %5 : f32 to vector<1x2xf32>
        %223 = arith.mulf %222, %221 : vector<1x2xf32>
        %224 = vector.broadcast %6 : f32 to vector<1x2xf32>
        %225 = arith.mulf %224, %190 : vector<1x2xf32>
        %226 = arith.addf %223, %225 : vector<1x2xf32>
        %227 = vector.broadcast %7 : f32 to vector<1x2xf32>
        %228 = arith.mulf %227, %159 : vector<1x2xf32>
        %229 = arith.addf %226, %228 : vector<1x2xf32>
        %230 = vector.broadcast %8 : f32 to vector<1x2xf32>
        %231 = arith.mulf %230, %204 : vector<1x2xf32>
        %232 = arith.subf %229, %231 : vector<1x2xf32>
        %233 = vector.broadcast %9 : f32 to vector<1x2xf32>
        %234 = arith.mulf %233, %173 : vector<1x2xf32>
        %235 = arith.subf %232, %234 : vector<1x2xf32>
        %236 = arith.mulf %235, %235 : vector<1x2xf32>
        %237 = arith.addf %206, %236 : vector<1x2xf32>
        %238 = vector.extract_strided_slice %51 {offsets = [6, 0], sizes = [1, 2], strides = [1, 1]} : vector<8x2xf32> to vector<1x2xf32>
        %239 = vector.broadcast %0 : f32 to vector<1x2xf32>
        %240 = arith.mulf %239, %238 : vector<1x2xf32>
        %241 = vector.broadcast %1 : f32 to vector<1x2xf32>
        %242 = arith.mulf %241, %207 : vector<1x2xf32>
        %243 = arith.addf %240, %242 : vector<1x2xf32>
        %244 = vector.broadcast %2 : f32 to vector<1x2xf32>
        %245 = arith.mulf %244, %176 : vector<1x2xf32>
        %246 = arith.addf %243, %245 : vector<1x2xf32>
        %247 = vector.broadcast %3 : f32 to vector<1x2xf32>
        %248 = arith.mulf %247, %221 : vector<1x2xf32>
        %249 = arith.subf %246, %248 : vector<1x2xf32>
        %250 = vector.broadcast %4 : f32 to vector<1x2xf32>
        %251 = arith.mulf %250, %190 : vector<1x2xf32>
        %252 = arith.subf %249, %251 : vector<1x2xf32>
        %253 = vector.broadcast %5 : f32 to vector<1x2xf32>
        %254 = arith.mulf %253, %252 : vector<1x2xf32>
        %255 = vector.broadcast %6 : f32 to vector<1x2xf32>
        %256 = arith.mulf %255, %221 : vector<1x2xf32>
        %257 = arith.addf %254, %256 : vector<1x2xf32>
        %258 = vector.broadcast %7 : f32 to vector<1x2xf32>
        %259 = arith.mulf %258, %190 : vector<1x2xf32>
        %260 = arith.addf %257, %259 : vector<1x2xf32>
        %261 = vector.broadcast %8 : f32 to vector<1x2xf32>
        %262 = arith.mulf %261, %235 : vector<1x2xf32>
        %263 = arith.subf %260, %262 : vector<1x2xf32>
        %264 = vector.broadcast %9 : f32 to vector<1x2xf32>
        %265 = arith.mulf %264, %204 : vector<1x2xf32>
        %266 = arith.subf %263, %265 : vector<1x2xf32>
        %267 = arith.mulf %266, %266 : vector<1x2xf32>
        %268 = arith.addf %237, %267 : vector<1x2xf32>
        %269 = vector.extract_strided_slice %51 {offsets = [7, 0], sizes = [1, 2], strides = [1, 1]} : vector<8x2xf32> to vector<1x2xf32>
        %270 = vector.broadcast %0 : f32 to vector<1x2xf32>
        %271 = arith.mulf %270, %269 : vector<1x2xf32>
        %272 = vector.broadcast %1 : f32 to vector<1x2xf32>
        %273 = arith.mulf %272, %238 : vector<1x2xf32>
        %274 = arith.addf %271, %273 : vector<1x2xf32>
        %275 = vector.broadcast %2 : f32 to vector<1x2xf32>
        %276 = arith.mulf %275, %207 : vector<1x2xf32>
        %277 = arith.addf %274, %276 : vector<1x2xf32>
        %278 = vector.broadcast %3 : f32 to vector<1x2xf32>
        %279 = arith.mulf %278, %252 : vector<1x2xf32>
        %280 = arith.subf %277, %279 : vector<1x2xf32>
        %281 = vector.broadcast %4 : f32 to vector<1x2xf32>
        %282 = arith.mulf %281, %221 : vector<1x2xf32>
        %283 = arith.subf %280, %282 : vector<1x2xf32>
        %284 = vector.broadcast %5 : f32 to vector<1x2xf32>
        %285 = arith.mulf %284, %283 : vector<1x2xf32>
        %286 = vector.broadcast %6 : f32 to vector<1x2xf32>
        %287 = arith.mulf %286, %252 : vector<1x2xf32>
        %288 = arith.addf %285, %287 : vector<1x2xf32>
        %289 = vector.broadcast %7 : f32 to vector<1x2xf32>
        %290 = arith.mulf %289, %221 : vector<1x2xf32>
        %291 = arith.addf %288, %290 : vector<1x2xf32>
        %292 = vector.broadcast %8 : f32 to vector<1x2xf32>
        %293 = arith.mulf %292, %266 : vector<1x2xf32>
        %294 = arith.subf %291, %293 : vector<1x2xf32>
        %295 = vector.broadcast %9 : f32 to vector<1x2xf32>
        %296 = arith.mulf %295, %235 : vector<1x2xf32>
        %297 = arith.subf %294, %296 : vector<1x2xf32>
        %298 = arith.mulf %297, %297 : vector<1x2xf32>
        %299 = arith.addf %268, %298 : vector<1x2xf32>
        scf.yield %269, %238, %283, %252, %283, %252, %297, %266, %299 : vector<1x2xf32>, vector<1x2xf32>, vector<1x2xf32>, vector<1x2xf32>, vector<1x2xf32>, vector<1x2xf32>, vector<1x2xf32>, vector<1x2xf32>, vector<1x2xf32>
      }
      %c50_i32_27 = arith.constant 50 : i32
      %27 = arith.index_cast %19 : i32 to index
      %c0_28 = arith.constant 0 : index
      %28 = vector.load %arg3[%27, %c0_28] : memref<10x2xf32, #tpu.memory_space<vmem>>, vector<1x2xf32>
      tpu.vector_store %arg3[%27, %c0_28], %26#8 {strides = array<i32>} : memref<10x2xf32, #tpu.memory_space<vmem>>, vector<1x2xf32>,
      %c2_i32_29 = arith.constant 2 : i32
      %29 = arith.addi %19, %c2_i32_29 : i32
      %c10_i32 = arith.constant 10 : i32
      %30 = arith.cmpi slt, %29, %c10_i32 : i32
      %31 = arith.extui %30 : i1 to i32
      %c0_i32_30 = arith.constant 0 : i32
      %32 = arith.cmpi ne, %31, %c0_i32_30 : i32
      scf.if %32 {
        %c2_i32_44 = arith.constant 2 : i32
        %48 = arith.addi %19, %c2_i32_44 : i32
        %c400_i32_45 = arith.constant 400 : i32
        %49 = arith.muli %48, %c400_i32_45 : i32
        %c0_i32_46 = arith.constant 0 : i32
        %c0_i32_47 = arith.constant 0 : i32
        %50 = tpu.memref_slice %arg2[%49, %c0_i32_47] : memref<4000x2xf32, #tpu.memory_space<any>> -> memref<400x2xf32, #tpu.memory_space<any>>
        %51 = tpu.memref_slice %arg6[%c0_i32_46] : memref<2x!tpu.dma_semaphore, #tpu.memory_space<semaphore_mem>> -> memref<1x!tpu.dma_semaphore, #tpu.memory_space<semaphore_mem>>
        %52 = tpu.memref_squeeze %51 : memref<1x!tpu.dma_semaphore, #tpu.memory_space<semaphore_mem>> -> memref<!tpu.dma_semaphore, #tpu.memory_space<semaphore_mem>>
        tpu.enqueue_dma source(%50 : memref<400x2xf32, #tpu.memory_space<any>>) target(%arg4 : memref<400x2xf32, #tpu.memory_space<vmem>>) target_semaphore(%52 : memref<!tpu.dma_semaphore, #tpu.memory_space<semaphore_mem>>)
      } else {
      }
      %c1_i32_31 = arith.constant 1 : i32
      %33 = arith.addi %19, %c1_i32_31 : i32
      %c400_i32_32 = arith.constant 400 : i32
      %34 = arith.muli %33, %c400_i32_32 : i32
      %c1_i32_33 = arith.constant 1 : i32
      %c0_i32_34 = arith.constant 0 : i32
      %35 = tpu.memref_slice %arg2[%34, %c0_i32_34] : memref<4000x2xf32, #tpu.memory_space<any>> -> memref<400x2xf32, #tpu.memory_space<any>>
      %36 = tpu.memref_slice %arg6[%c1_i32_33] : memref<2x!tpu.dma_semaphore, #tpu.memory_space<semaphore_mem>> -> memref<1x!tpu.dma_semaphore, #tpu.memory_space<semaphore_mem>>
      %37 = tpu.memref_squeeze %36 : memref<1x!tpu.dma_semaphore, #tpu.memory_space<semaphore_mem>> -> memref<!tpu.dma_semaphore, #tpu.memory_space<semaphore_mem>>
      tpu.wait_dma2 semaphore(%37 : memref<!tpu.dma_semaphore, #tpu.memory_space<semaphore_mem>>) src(%35 : memref<400x2xf32, #tpu.memory_space<any>>) dst(%arg5 : memref<400x2xf32, #tpu.memory_space<vmem>>)
      %c1_i32_35 = arith.constant 1 : i32
      %38 = arith.addi %19, %c1_i32_35 : i32
      %cst_36 = arith.constant 0.000000e+00 : f32
      %39 = vector.broadcast %cst_36 : f32 to vector<1x2xf32>
      %c0_i32_37 = arith.constant 0 : i32
      %c50_i32_38 = arith.constant 50 : i32
      %40 = arith.addi %c0_i32_37, %c50_i32_38 : i32
      %c1_i32_39 = arith.constant 1 : i32
      %41:9 = scf.for %arg16 = %c0_i32_37 to %40 step %c1_i32_39 iter_args(%arg17 = %26#0, %arg18 = %26#1, %arg19 = %26#2, %arg20 = %26#3, %arg21 = %26#4, %arg22 = %26#5, %arg23 = %26#6, %arg24 = %26#7, %arg25 = %39) -> (vector<1x2xf32>, vector<1x2xf32>, vector<1x2xf32>, vector<1x2xf32>, vector<1x2xf32>, vector<1x2xf32>, vector<1x2xf32>, vector<1x2xf32>, vector<1x2xf32>)  : i32 {
        %c8_i32 = arith.constant 8 : i32
        %48 = arith.muli %arg16, %c8_i32 : i32
        %49 = tpu.assume_multiple %48, 8 : i32
        %50 = arith.index_cast %49 : i32 to index
        %c0_44 = arith.constant 0 : index
        %51 = vector.load %arg5[%50, %c0_44] : memref<400x2xf32, #tpu.memory_space<vmem>>, vector<8x2xf32>
        %52 = vector.extract_strided_slice %51 {offsets = [0, 0], sizes = [1, 2], strides = [1, 1]} : vector<8x2xf32> to vector<1x2xf32>
        %53 = vector.broadcast %0 : f32 to vector<1x2xf32>
        %54 = arith.mulf %53, %52 : vector<1x2xf32>
        %55 = vector.broadcast %1 : f32 to vector<1x2xf32>
        %56 = arith.mulf %55, %arg17 : vector<1x2xf32>
        %57 = arith.addf %54, %56 : vector<1x2xf32>
        %58 = vector.broadcast %2 : f32 to vector<1x2xf32>
        %59 = arith.mulf %58, %arg18 : vector<1x2xf32>
        %60 = arith.addf %57, %59 : vector<1x2xf32>
        %61 = vector.broadcast %3 : f32 to vector<1x2xf32>
        %62 = arith.mulf %61, %arg19 : vector<1x2xf32>
        %63 = arith.subf %60, %62 : vector<1x2xf32>
        %64 = vector.broadcast %4 : f32 to vector<1x2xf32>
        %65 = arith.mulf %64, %arg20 : vector<1x2xf32>
        %66 = arith.subf %63, %65 : vector<1x2xf32>
        %67 = vector.broadcast %5 : f32 to vector<1x2xf32>
        %68 = arith.mulf %67, %66 : vector<1x2xf32>
        %69 = vector.broadcast %6 : f32 to vector<1x2xf32>
        %70 = arith.mulf %69, %arg21 : vector<1x2xf32>
        %71 = arith.addf %68, %70 : vector<1x2xf32>
        %72 = vector.broadcast %7 : f32 to vector<1x2xf32>
        %73 = arith.mulf %72, %arg22 : vector<1x2xf32>
        %74 = arith.addf %71, %73 : vector<1x2xf32>
        %75 = vector.broadcast %8 : f32 to vector<1x2xf32>
        %76 = arith.mulf %75, %arg23 : vector<1x2xf32>
        %77 = arith.subf %74, %76 : vector<1x2xf32>
        %78 = vector.broadcast %9 : f32 to vector<1x2xf32>
        %79 = arith.mulf %78, %arg24 : vector<1x2xf32>
        %80 = arith.subf %77, %79 : vector<1x2xf32>
        %81 = arith.mulf %80, %80 : vector<1x2xf32>
        %82 = arith.addf %arg25, %81 : vector<1x2xf32>
        %83 = vector.extract_strided_slice %51 {offsets = [1, 0], sizes = [1, 2], strides = [1, 1]} : vector<8x2xf32> to vector<1x2xf32>
        %84 = vector.broadcast %0 : f32 to vector<1x2xf32>
        %85 = arith.mulf %84, %83 : vector<1x2xf32>
        %86 = vector.broadcast %1 : f32 to vector<1x2xf32>
        %87 = arith.mulf %86, %52 : vector<1x2xf32>
        %88 = arith.addf %85, %87 : vector<1x2xf32>
        %89 = vector.broadcast %2 : f32 to vector<1x2xf32>
        %90 = arith.mulf %89, %arg17 : vector<1x2xf32>
        %91 = arith.addf %88, %90 : vector<1x2xf32>
        %92 = vector.broadcast %3 : f32 to vector<1x2xf32>
        %93 = arith.mulf %92, %66 : vector<1x2xf32>
        %94 = arith.subf %91, %93 : vector<1x2xf32>
        %95 = vector.broadcast %4 : f32 to vector<1x2xf32>
        %96 = arith.mulf %95, %arg19 : vector<1x2xf32>
        %97 = arith.subf %94, %96 : vector<1x2xf32>
        %98 = vector.broadcast %5 : f32 to vector<1x2xf32>
        %99 = arith.mulf %98, %97 : vector<1x2xf32>
        %100 = vector.broadcast %6 : f32 to vector<1x2xf32>
        %101 = arith.mulf %100, %66 : vector<1x2xf32>
        %102 = arith.addf %99, %101 : vector<1x2xf32>
        %103 = vector.broadcast %7 : f32 to vector<1x2xf32>
        %104 = arith.mulf %103, %arg21 : vector<1x2xf32>
        %105 = arith.addf %102, %104 : vector<1x2xf32>
        %106 = vector.broadcast %8 : f32 to vector<1x2xf32>
        %107 = arith.mulf %106, %80 : vector<1x2xf32>
        %108 = arith.subf %105, %107 : vector<1x2xf32>
        %109 = vector.broadcast %9 : f32 to vector<1x2xf32>
        %110 = arith.mulf %109, %arg23 : vector<1x2xf32>
        %111 = arith.subf %108, %110 : vector<1x2xf32>
        %112 = arith.mulf %111, %111 : vector<1x2xf32>
        %113 = arith.addf %82, %112 : vector<1x2xf32>
        %114 = vector.extract_strided_slice %51 {offsets = [2, 0], sizes = [1, 2], strides = [1, 1]} : vector<8x2xf32> to vector<1x2xf32>
        %115 = vector.broadcast %0 : f32 to vector<1x2xf32>
        %116 = arith.mulf %115, %114 : vector<1x2xf32>
        %117 = vector.broadcast %1 : f32 to vector<1x2xf32>
        %118 = arith.mulf %117, %83 : vector<1x2xf32>
        %119 = arith.addf %116, %118 : vector<1x2xf32>
        %120 = vector.broadcast %2 : f32 to vector<1x2xf32>
        %121 = arith.mulf %120, %52 : vector<1x2xf32>
        %122 = arith.addf %119, %121 : vector<1x2xf32>
        %123 = vector.broadcast %3 : f32 to vector<1x2xf32>
        %124 = arith.mulf %123, %97 : vector<1x2xf32>
        %125 = arith.subf %122, %124 : vector<1x2xf32>
        %126 = vector.broadcast %4 : f32 to vector<1x2xf32>
        %127 = arith.mulf %126, %66 : vector<1x2xf32>
        %128 = arith.subf %125, %127 : vector<1x2xf32>
        %129 = vector.broadcast %5 : f32 to vector<1x2xf32>
        %130 = arith.mulf %129, %128 : vector<1x2xf32>
        %131 = vector.broadcast %6 : f32 to vector<1x2xf32>
        %132 = arith.mulf %131, %97 : vector<1x2xf32>
        %133 = arith.addf %130, %132 : vector<1x2xf32>
        %134 = vector.broadcast %7 : f32 to vector<1x2xf32>
        %135 = arith.mulf %134, %66 : vector<1x2xf32>
        %136 = arith.addf %133, %135 : vector<1x2xf32>
        %137 = vector.broadcast %8 : f32 to vector<1x2xf32>
        %138 = arith.mulf %137, %111 : vector<1x2xf32>
        %139 = arith.subf %136, %138 : vector<1x2xf32>
        %140 = vector.broadcast %9 : f32 to vector<1x2xf32>
        %141 = arith.mulf %140, %80 : vector<1x2xf32>
        %142 = arith.subf %139, %141 : vector<1x2xf32>
        %143 = arith.mulf %142, %142 : vector<1x2xf32>
        %144 = arith.addf %113, %143 : vector<1x2xf32>
        %145 = vector.extract_strided_slice %51 {offsets = [3, 0], sizes = [1, 2], strides = [1, 1]} : vector<8x2xf32> to vector<1x2xf32>
        %146 = vector.broadcast %0 : f32 to vector<1x2xf32>
        %147 = arith.mulf %146, %145 : vector<1x2xf32>
        %148 = vector.broadcast %1 : f32 to vector<1x2xf32>
        %149 = arith.mulf %148, %114 : vector<1x2xf32>
        %150 = arith.addf %147, %149 : vector<1x2xf32>
        %151 = vector.broadcast %2 : f32 to vector<1x2xf32>
        %152 = arith.mulf %151, %83 : vector<1x2xf32>
        %153 = arith.addf %150, %152 : vector<1x2xf32>
        %154 = vector.broadcast %3 : f32 to vector<1x2xf32>
        %155 = arith.mulf %154, %128 : vector<1x2xf32>
        %156 = arith.subf %153, %155 : vector<1x2xf32>
        %157 = vector.broadcast %4 : f32 to vector<1x2xf32>
        %158 = arith.mulf %157, %97 : vector<1x2xf32>
        %159 = arith.subf %156, %158 : vector<1x2xf32>
        %160 = vector.broadcast %5 : f32 to vector<1x2xf32>
        %161 = arith.mulf %160, %159 : vector<1x2xf32>
        %162 = vector.broadcast %6 : f32 to vector<1x2xf32>
        %163 = arith.mulf %162, %128 : vector<1x2xf32>
        %164 = arith.addf %161, %163 : vector<1x2xf32>
        %165 = vector.broadcast %7 : f32 to vector<1x2xf32>
        %166 = arith.mulf %165, %97 : vector<1x2xf32>
        %167 = arith.addf %164, %166 : vector<1x2xf32>
        %168 = vector.broadcast %8 : f32 to vector<1x2xf32>
        %169 = arith.mulf %168, %142 : vector<1x2xf32>
        %170 = arith.subf %167, %169 : vector<1x2xf32>
        %171 = vector.broadcast %9 : f32 to vector<1x2xf32>
        %172 = arith.mulf %171, %111 : vector<1x2xf32>
        %173 = arith.subf %170, %172 : vector<1x2xf32>
        %174 = arith.mulf %173, %173 : vector<1x2xf32>
        %175 = arith.addf %144, %174 : vector<1x2xf32>
        %176 = vector.extract_strided_slice %51 {offsets = [4, 0], sizes = [1, 2], strides = [1, 1]} : vector<8x2xf32> to vector<1x2xf32>
        %177 = vector.broadcast %0 : f32 to vector<1x2xf32>
        %178 = arith.mulf %177, %176 : vector<1x2xf32>
        %179 = vector.broadcast %1 : f32 to vector<1x2xf32>
        %180 = arith.mulf %179, %145 : vector<1x2xf32>
        %181 = arith.addf %178, %180 : vector<1x2xf32>
        %182 = vector.broadcast %2 : f32 to vector<1x2xf32>
        %183 = arith.mulf %182, %114 : vector<1x2xf32>
        %184 = arith.addf %181, %183 : vector<1x2xf32>
        %185 = vector.broadcast %3 : f32 to vector<1x2xf32>
        %186 = arith.mulf %185, %159 : vector<1x2xf32>
        %187 = arith.subf %184, %186 : vector<1x2xf32>
        %188 = vector.broadcast %4 : f32 to vector<1x2xf32>
        %189 = arith.mulf %188, %128 : vector<1x2xf32>
        %190 = arith.subf %187, %189 : vector<1x2xf32>
        %191 = vector.broadcast %5 : f32 to vector<1x2xf32>
        %192 = arith.mulf %191, %190 : vector<1x2xf32>
        %193 = vector.broadcast %6 : f32 to vector<1x2xf32>
        %194 = arith.mulf %193, %159 : vector<1x2xf32>
        %195 = arith.addf %192, %194 : vector<1x2xf32>
        %196 = vector.broadcast %7 : f32 to vector<1x2xf32>
        %197 = arith.mulf %196, %128 : vector<1x2xf32>
        %198 = arith.addf %195, %197 : vector<1x2xf32>
        %199 = vector.broadcast %8 : f32 to vector<1x2xf32>
        %200 = arith.mulf %199, %173 : vector<1x2xf32>
        %201 = arith.subf %198, %200 : vector<1x2xf32>
        %202 = vector.broadcast %9 : f32 to vector<1x2xf32>
        %203 = arith.mulf %202, %142 : vector<1x2xf32>
        %204 = arith.subf %201, %203 : vector<1x2xf32>
        %205 = arith.mulf %204, %204 : vector<1x2xf32>
        %206 = arith.addf %175, %205 : vector<1x2xf32>
        %207 = vector.extract_strided_slice %51 {offsets = [5, 0], sizes = [1, 2], strides = [1, 1]} : vector<8x2xf32> to vector<1x2xf32>
        %208 = vector.broadcast %0 : f32 to vector<1x2xf32>
        %209 = arith.mulf %208, %207 : vector<1x2xf32>
        %210 = vector.broadcast %1 : f32 to vector<1x2xf32>
        %211 = arith.mulf %210, %176 : vector<1x2xf32>
        %212 = arith.addf %209, %211 : vector<1x2xf32>
        %213 = vector.broadcast %2 : f32 to vector<1x2xf32>
        %214 = arith.mulf %213, %145 : vector<1x2xf32>
        %215 = arith.addf %212, %214 : vector<1x2xf32>
        %216 = vector.broadcast %3 : f32 to vector<1x2xf32>
        %217 = arith.mulf %216, %190 : vector<1x2xf32>
        %218 = arith.subf %215, %217 : vector<1x2xf32>
        %219 = vector.broadcast %4 : f32 to vector<1x2xf32>
        %220 = arith.mulf %219, %159 : vector<1x2xf32>
        %221 = arith.subf %218, %220 : vector<1x2xf32>
        %222 = vector.broadcast %5 : f32 to vector<1x2xf32>
        %223 = arith.mulf %222, %221 : vector<1x2xf32>
        %224 = vector.broadcast %6 : f32 to vector<1x2xf32>
        %225 = arith.mulf %224, %190 : vector<1x2xf32>
        %226 = arith.addf %223, %225 : vector<1x2xf32>
        %227 = vector.broadcast %7 : f32 to vector<1x2xf32>
        %228 = arith.mulf %227, %159 : vector<1x2xf32>
        %229 = arith.addf %226, %228 : vector<1x2xf32>
        %230 = vector.broadcast %8 : f32 to vector<1x2xf32>
        %231 = arith.mulf %230, %204 : vector<1x2xf32>
        %232 = arith.subf %229, %231 : vector<1x2xf32>
        %233 = vector.broadcast %9 : f32 to vector<1x2xf32>
        %234 = arith.mulf %233, %173 : vector<1x2xf32>
        %235 = arith.subf %232, %234 : vector<1x2xf32>
        %236 = arith.mulf %235, %235 : vector<1x2xf32>
        %237 = arith.addf %206, %236 : vector<1x2xf32>
        %238 = vector.extract_strided_slice %51 {offsets = [6, 0], sizes = [1, 2], strides = [1, 1]} : vector<8x2xf32> to vector<1x2xf32>
        %239 = vector.broadcast %0 : f32 to vector<1x2xf32>
        %240 = arith.mulf %239, %238 : vector<1x2xf32>
        %241 = vector.broadcast %1 : f32 to vector<1x2xf32>
        %242 = arith.mulf %241, %207 : vector<1x2xf32>
        %243 = arith.addf %240, %242 : vector<1x2xf32>
        %244 = vector.broadcast %2 : f32 to vector<1x2xf32>
        %245 = arith.mulf %244, %176 : vector<1x2xf32>
        %246 = arith.addf %243, %245 : vector<1x2xf32>
        %247 = vector.broadcast %3 : f32 to vector<1x2xf32>
        %248 = arith.mulf %247, %221 : vector<1x2xf32>
        %249 = arith.subf %246, %248 : vector<1x2xf32>
        %250 = vector.broadcast %4 : f32 to vector<1x2xf32>
        %251 = arith.mulf %250, %190 : vector<1x2xf32>
        %252 = arith.subf %249, %251 : vector<1x2xf32>
        %253 = vector.broadcast %5 : f32 to vector<1x2xf32>
        %254 = arith.mulf %253, %252 : vector<1x2xf32>
        %255 = vector.broadcast %6 : f32 to vector<1x2xf32>
        %256 = arith.mulf %255, %221 : vector<1x2xf32>
        %257 = arith.addf %254, %256 : vector<1x2xf32>
        %258 = vector.broadcast %7 : f32 to vector<1x2xf32>
        %259 = arith.mulf %258, %190 : vector<1x2xf32>
        %260 = arith.addf %257, %259 : vector<1x2xf32>
        %261 = vector.broadcast %8 : f32 to vector<1x2xf32>
        %262 = arith.mulf %261, %235 : vector<1x2xf32>
        %263 = arith.subf %260, %262 : vector<1x2xf32>
        %264 = vector.broadcast %9 : f32 to vector<1x2xf32>
        %265 = arith.mulf %264, %204 : vector<1x2xf32>
        %266 = arith.subf %263, %265 : vector<1x2xf32>
        %267 = arith.mulf %266, %266 : vector<1x2xf32>
        %268 = arith.addf %237, %267 : vector<1x2xf32>
        %269 = vector.extract_strided_slice %51 {offsets = [7, 0], sizes = [1, 2], strides = [1, 1]} : vector<8x2xf32> to vector<1x2xf32>
        %270 = vector.broadcast %0 : f32 to vector<1x2xf32>
        %271 = arith.mulf %270, %269 : vector<1x2xf32>
        %272 = vector.broadcast %1 : f32 to vector<1x2xf32>
        %273 = arith.mulf %272, %238 : vector<1x2xf32>
        %274 = arith.addf %271, %273 : vector<1x2xf32>
        %275 = vector.broadcast %2 : f32 to vector<1x2xf32>
        %276 = arith.mulf %275, %207 : vector<1x2xf32>
        %277 = arith.addf %274, %276 : vector<1x2xf32>
        %278 = vector.broadcast %3 : f32 to vector<1x2xf32>
        %279 = arith.mulf %278, %252 : vector<1x2xf32>
        %280 = arith.subf %277, %279 : vector<1x2xf32>
        %281 = vector.broadcast %4 : f32 to vector<1x2xf32>
        %282 = arith.mulf %281, %221 : vector<1x2xf32>
        %283 = arith.subf %280, %282 : vector<1x2xf32>
        %284 = vector.broadcast %5 : f32 to vector<1x2xf32>
        %285 = arith.mulf %284, %283 : vector<1x2xf32>
        %286 = vector.broadcast %6 : f32 to vector<1x2xf32>
        %287 = arith.mulf %286, %252 : vector<1x2xf32>
        %288 = arith.addf %285, %287 : vector<1x2xf32>
        %289 = vector.broadcast %7 : f32 to vector<1x2xf32>
        %290 = arith.mulf %289, %221 : vector<1x2xf32>
        %291 = arith.addf %288, %290 : vector<1x2xf32>
        %292 = vector.broadcast %8 : f32 to vector<1x2xf32>
        %293 = arith.mulf %292, %266 : vector<1x2xf32>
        %294 = arith.subf %291, %293 : vector<1x2xf32>
        %295 = vector.broadcast %9 : f32 to vector<1x2xf32>
        %296 = arith.mulf %295, %235 : vector<1x2xf32>
        %297 = arith.subf %294, %296 : vector<1x2xf32>
        %298 = arith.mulf %297, %297 : vector<1x2xf32>
        %299 = arith.addf %268, %298 : vector<1x2xf32>
        scf.yield %269, %238, %283, %252, %283, %252, %297, %266, %299 : vector<1x2xf32>, vector<1x2xf32>, vector<1x2xf32>, vector<1x2xf32>, vector<1x2xf32>, vector<1x2xf32>, vector<1x2xf32>, vector<1x2xf32>, vector<1x2xf32>
      }
      %c50_i32_40 = arith.constant 50 : i32
      %42 = arith.index_cast %38 : i32 to index
      %c0_41 = arith.constant 0 : index
      %43 = vector.load %arg3[%42, %c0_41] : memref<10x2xf32, #tpu.memory_space<vmem>>, vector<1x2xf32>
      tpu.vector_store %arg3[%42, %c0_41], %41#8 {strides = array<i32>} : memref<10x2xf32, #tpu.memory_space<vmem>>, vector<1x2xf32>,
      %c3_i32 = arith.constant 3 : i32
      %44 = arith.addi %19, %c3_i32 : i32
      %c10_i32_42 = arith.constant 10 : i32
      %45 = arith.cmpi slt, %44, %c10_i32_42 : i32
      %46 = arith.extui %45 : i1 to i32
      %c0_i32_43 = arith.constant 0 : i32
      %47 = arith.cmpi ne, %46, %c0_i32_43 : i32
      scf.if %47 {
        %c3_i32_44 = arith.constant 3 : i32
        %48 = arith.addi %19, %c3_i32_44 : i32
        %c400_i32_45 = arith.constant 400 : i32
        %49 = arith.muli %48, %c400_i32_45 : i32
        %c1_i32_46 = arith.constant 1 : i32
        %c0_i32_47 = arith.constant 0 : i32
        %50 = tpu.memref_slice %arg2[%49, %c0_i32_47] : memref<4000x2xf32, #tpu.memory_space<any>> -> memref<400x2xf32, #tpu.memory_space<any>>
        %51 = tpu.memref_slice %arg6[%c1_i32_46] : memref<2x!tpu.dma_semaphore, #tpu.memory_space<semaphore_mem>> -> memref<1x!tpu.dma_semaphore, #tpu.memory_space<semaphore_mem>>
        %52 = tpu.memref_squeeze %51 : memref<1x!tpu.dma_semaphore, #tpu.memory_space<semaphore_mem>> -> memref<!tpu.dma_semaphore, #tpu.memory_space<semaphore_mem>>
        tpu.enqueue_dma source(%50 : memref<400x2xf32, #tpu.memory_space<any>>) target(%arg5 : memref<400x2xf32, #tpu.memory_space<vmem>>) target_semaphore(%52 : memref<!tpu.dma_semaphore, #tpu.memory_space<semaphore_mem>>)
      } else {
      }
      scf.yield %41#0, %41#1, %41#2, %41#3, %41#4, %41#5, %41#6, %41#7 : vector<1x2xf32>, vector<1x2xf32>, vector<1x2xf32>, vector<1x2xf32>, vector<1x2xf32>, vector<1x2xf32>, vector<1x2xf32>, vector<1x2xf32>
    }
    %c5_i32_20 = arith.constant 5 : i32
    return
  }
  func.func @transform_0(%arg0: i32) -> (i32, i32) {
    %c0_i32 = arith.constant 0 : i32
    %c0_i32_0 = arith.constant 0 : i32
    %c0_i32_1 = arith.constant 0 : i32
    return %c0_i32, %c0_i32_0 : i32, i32
  }
  func.func @transform_2(%arg0: i32) -> (i32, i32) {
    %c0_i32 = arith.constant 0 : i32
    %c0_i32_0 = arith.constant 0 : i32
    %c0_i32_1 = arith.constant 0 : i32
    return %c0_i32, %c0_i32_0 : i32, i32
  }
}

module attributes {stable_mosaic.version = 11 : i64} {
  func.func @_apply_gain_kernel(%arg0: i32, %arg1: memref<1xf32, #tpu.memory_space<smem>>, %arg2: memref<2x4000xf32, #tpu.memory_space<vmem>>, %arg3: memref<2x4000xf32, #tpu.memory_space<vmem>>) attributes {dimension_semantics = [#tpu.dimension_semantics<parallel>], iteration_bounds = array<i64: 1>, scalar_prefetch = 0 : i64, scratch_operands = 0 : i64, tpu.core_type = #tpu.core_type<tc>, window_params = [{transform_indices = @transform_0, window_bounds = array<i64: 1>}, {transform_indices = @transform_1, window_bounds = array<i64: 2, 4000>}, {transform_indices = @transform_2, window_bounds = array<i64: 2, 4000>}]} {
    %c0 = arith.constant 0 : index
    %c0_0 = arith.constant 0 : index
    %0 = vector.load %arg2[%c0, %c0_0] : memref<2x4000xf32, #tpu.memory_space<vmem>>, vector<2x4000xf32>
    %c0_1 = arith.constant 0 : index
    %1 = memref.load %arg1[%c0_1] : memref<1xf32, #tpu.memory_space<smem>>
    %2 = vector.broadcast %1 : f32 to vector<2x4000xf32>
    %3 = arith.mulf %0, %2 : vector<2x4000xf32>
    %c0_2 = arith.constant 0 : index
    %c0_3 = arith.constant 0 : index
    %4 = vector.load %arg3[%c0_2, %c0_3] : memref<2x4000xf32, #tpu.memory_space<vmem>>, vector<2x4000xf32>
    tpu.vector_store %arg3[%c0_2, %c0_3], %3 {strides = array<i32>} : memref<2x4000xf32, #tpu.memory_space<vmem>>, vector<2x4000xf32>,
    return
  }
  func.func @transform_0(%arg0: i32) -> i32 {
    %c0_i32 = arith.constant 0 : i32
    %c0_i32_0 = arith.constant 0 : i32
    return %c0_i32 : i32
  }
  func.func @transform_1(%arg0: i32) -> (i32, i32) {
    %c0_i32 = arith.constant 0 : i32
    %c0_i32_0 = arith.constant 0 : i32
    return %c0_i32, %arg0 : i32, i32
  }
  func.func @transform_2(%arg0: i32) -> (i32, i32) {
    %c0_i32 = arith.constant 0 : i32
    %c0_i32_0 = arith.constant 0 : i32
    return %c0_i32, %arg0 : i32, i32
  }
}

</mosaic_0001>

<bundles_post_ra>
// kernel: _forward_impl.3
= control target key start
LH: loop header
LB: loop body
LE: loop exit
PB: predicated region body
PF: predicated region fallthrough
CT: control target
= control target key end

     0   :  { %vm38_vm0 = vcmask 1041408   ;;  %vm39_vm1 = vcmask 1043458   ;;  %vm41_vm2 = vcmask 1045508   ;;  %vm43_vm5 = vcmask 261126   ;;  %s135_s0 = inlined_call_operand.<no memory space> [shape: f32[1], index: 0, kind: input, shape index: {}]   ;;  %s136_s1 = inlined_call_operand.vmem [shape: f32[2,4000], index: 1, kind: input, shape index: {}]   ;;  %s137_s2 = inlined_call_operand.hbm [shape: f32[2,4000], index: 2, kind: output, shape index: {}]  }
   0x1   :  { %v13_v0 = vld [vmem:[%s136_s1] sm:$0xff]  ;;  %v22_v1 = vstv %s135_s0  ;;  %v14_v2 = vld [vmem:[%s136_s1 + $0x8] sm:$0xff]  ;;  %v15_v3 = vld [vmem:[%s136_s1 + $0x10] sm:$0xff] }
   0x2   :  { %v23_v4 = vmul.f32 %v22_v1, %v13_v0  ;;  %v24_v5 = vmul.f32 %v22_v1, %v14_v2  ;;  %v25_v6 = vmul.f32 %v22_v1, %v15_v3  ;;  %v16_v7 = vld [vmem:[%s136_s1 + $0x18] sm:$0xff]  ;;  %v17_v8 = vld [vmem:[%s136_s1 + $0x20] sm:$0xff]  ;;  %v18_v9 = vld [vmem:[%s136_s1 + $0x28] sm:$0xff] }
   0x3   :  { %v26_v10 = vmul.f32 %v22_v1, %v16_v7  ;;  %v19_v11 = vld [vmem:[%s136_s1 + $0x30] sm:$0xff]  ;;  %vm40_vm3 = vmor %vm39_vm1, %vm38_vm0  ;;  %v27_v12 = vmul.f32 %v22_v1, %v17_v8  ;;  %v20_v13 = vld [vmem:[%s136_s1 + $0x38] sm:$0xff]  ;;  %v28_v14 = vmul.f32 %v22_v1, %v18_v9 }
   0x4   :  { %31 = vst [vmem:[#allocation3] sm:$0xff] %v23_v4  ;;  %vm42_vm4 = vmor %vm41_vm2, %vm40_vm3  ;;  %v29_v15 = vmul.f32 %v22_v1, %v19_v11 }
   0x5   :  { %32 = vst [vmem:[#allocation3 + $0x8] sm:$0xff] %v24_v5 }
   0x6   :  { %33 = vst [vmem:[#allocation3 + $0x10] sm:$0xff] %v25_v6 }
   0x7   :  { %8 = vsyncpa [#allocation4], 0  ;;  %s89_s26 = smov [#allocation3]   ;;  %s53_s30 = sshll.u32 %s137_s2, 4  ;;  %34 = vst [vmem:[#allocation3 + $0x18] sm:$0xff] %v26_v10  ;;  %v30_v16 = vmul.f32 %v22_v1, %v20_v13  ;;  %s54_s30 = int_to_ptr.hbm [resolvable:$true] %s53_s30 }
   0x8   :  { %s51_s27 = sshll.u32 %s89_s26, 4  ;;  %35 = vst [vmem:[#allocation3 + $0x20] sm:$0xff] %v27_v12  ;;  %vm44_vm6 = vmor %vm43_vm5, %vm42_vm4  ;;  %s52_s27 = int_to_ptr.vmem [resolvable:$true] %s51_s27 }
   0x9   :  { %36 = vst [vmem:[#allocation3 + $0x28] sm:$0xff] %v28_v14 }
   0xa   :  { %37 = vst [vmem:[#allocation3 + $0x30] sm:$0xff] %v29_v15 }
   0xb   :  { %45 = vst.msk [vmem:[#allocation3 + $0x38] sm:$0xff] %vm44_vm6, %v30_v16 }
   0xc   :  { %56 = dma.vmem_to_hbm [thread:$0]  %s52_s27, 1024, %s54_s30, [#allocation4]  }
   0xd   :  { %87 = dma.done.wait [#allocation4], 1024  }
   0xe   :  { %88 = vsyncadd [#allocation4], 4294966272 }
   0xf   :  { %61 = vsyncpa [#allocation4], 1 }

// kernel: _forward_impl.2
= control target key start
LH: loop header
LB: loop body
LE: loop exit
PB: predicated region body
PF: predicated region fallthrough
CT: control target
= control target key end

     0   :  { %7 = vsyncpa [#allocation6], 0  ;;  %s1827_s12 = smov [#allocation5]   ;;  %s2654_s0 = inlined_call_operand.vmem [shape: f32[2,6], index: 0, kind: input, shape index: {}]   ;;  %s2655_s1 = inlined_call_operand.vmem [shape: f32[4000,2], index: 1, kind: input, shape index: {}]   ;;  %s2656_s2 = inlined_call_operand.vmem [shape: f32[10,2], index: 2, kind: output, shape index: {}]  }
   0x1   :  { %s13_s11 = sshll.u32 %s2654_s0, 4  ;;  %s14_s11 = int_to_ptr.vmem [resolvable:$true] %s13_s11 }
   0x2   :  { %16 = dma.vmem_to_smem %s14_s11, 32, %s1827_s12, [#allocation6]  }
   0x3   :  { %1741 = dma.done.wait [#allocation6], 32  }
   0x4   :  { %1742 = vsyncadd [#allocation6], 4294967264 }
   0x5   :  { %21 = sfence }
   0x6   :  { %s1846_s13 = sld [smem:[#allocation5]]  ;;  %v42_v0 = vld [vmem:[%s2655_s1] sm:$0xff]  ;;  %v44_v1 = vld [vmem:[%s2655_s1 + $0x8] sm:$0xff]  ;;  %v46_v2 = vld [vmem:[%s2655_s1 + $0x10] sm:$0xff] }
   0x7   :  { %s1857_s0 = sld [smem:[#allocation5 + $0x1]]  ;;  %43 = vst [vmem:[#allocation2] sm:$0xff] %v42_v0  ;;  %v48_v3 = vld [vmem:[%s2655_s1 + $0x18] sm:$0xff]  ;;  %v50_v4 = vld [vmem:[%s2655_s1 + $0x20] sm:$0xff]  ;;  %v52_v5 = vld [vmem:[%s2655_s1 + $0x28] sm:$0xff] }
   0x8   :  { %s1862_s22 = sld [smem:[#allocation5 + $0x2]]  ;;  %45 = vst [vmem:[#allocation2 + $0x8] sm:$0xff] %v44_v1  ;;  %v54_v6 = vld [vmem:[%s2655_s1 + $0x30] sm:$0xff]  ;;  %v56_v7 = vld [vmem:[%s2655_s1 + $0x38] sm:$0xff]  ;;  %v58_v8 = vld [vmem:[%s2655_s1 + $0x40] sm:$0xff] }
   0x9   :  { %s1867_s25 = sld [smem:[#allocation5 + $0x4]]  ;;  %47 = vst [vmem:[#allocation2 + $0x10] sm:$0xff] %v46_v2  ;;  %v60_v9 = vld [vmem:[%s2655_s1 + $0x48] sm:$0xff]  ;;  %v62_v10 = vld [vmem:[%s2655_s1 + $0x50] sm:$0xff]  ;;  %v64_v11 = vld [vmem:[%s2655_s1 + $0x58] sm:$0xff] }
   0xa   :  { %s1872_s28 = sld [smem:[#allocation5 + $0x5]]  ;;  %49 = vst [vmem:[#allocation2 + $0x18] sm:$0xff] %v48_v3  ;;  %v66_v12 = vld [vmem:[%s2655_s1 + $0x60] sm:$0xff]  ;;  %v68_v13 = vld [vmem:[%s2655_s1 + $0x68] sm:$0xff]  ;;  %v70_v14 = vld [vmem:[%s2655_s1 + $0x70] sm:$0xff] }
   0xb   :  { %s1877_s3 = sld [smem:[#allocation5 + $0x80]]  ;;  %51 = vst [vmem:[#allocation2 + $0x20] sm:$0xff] %v50_v4  ;;  %v72_v15 = vld [vmem:[%s2655_s1 + $0x78] sm:$0xff]  ;;  %v74_v16 = vld [vmem:[%s2655_s1 + $0x80] sm:$0xff]  ;;  %v76_v17 = vld [vmem:[%s2655_s1 + $0x88] sm:$0xff] }
   0xc   :  { %s1882_s6 = sld [smem:[#allocation5 + $0x81]]  ;;  %53 = vst [vmem:[#allocation2 + $0x28] sm:$0xff] %v52_v5  ;;  %v78_v18 = vld [vmem:[%s2655_s1 + $0x90] sm:$0xff]  ;;  %v80_v19 = vld [vmem:[%s2655_s1 + $0x98] sm:$0xff]  ;;  %v82_v20 = vld [vmem:[%s2655_s1 + $0xa0] sm:$0xff] }
   0xd   :  { %s1887_s9 = sld [smem:[#allocation5 + $0x82]]  ;;  %55 = vst [vmem:[#allocation2 + $0x30] sm:$0xff] %v54_v6  ;;  %v84_v21 = vld [vmem:[%s2655_s1 + $0xa8] sm:$0xff]  ;;  %v86_v22 = vld [vmem:[%s2655_s1 + $0xb0] sm:$0xff]  ;;  %v88_v23 = vld [vmem:[%s2655_s1 + $0xb8] sm:$0xff] }
   0xe   :  { %s1892_s12 = sld [smem:[#allocation5 + $0x84]]  ;;  %57 = vst [vmem:[#allocation2 + $0x38] sm:$0xff] %v56_v7  ;;  %v90_v24 = vld [vmem:[%s2655_s1 + $0xc0] sm:$0xff]  ;;  %v92_v25 = vld [vmem:[%s2655_s1 + $0xc8] sm:$0xff]  ;;  %v94_v26 = vld [vmem:[%s2655_s1 + $0xd0] sm:$0xff] }
   0xf   :  { %s1897_s16 = sld [smem:[#allocation5 + $0x85]]  ;;  %59 = vst [vmem:[#allocation2 + $0x40] sm:$0xff] %v58_v8  ;;  %v96_v27 = vld [vmem:[%s2655_s1 + $0xd8] sm:$0xff]  ;;  %v98_v28 = vld [vmem:[%s2655_s1 + $0xe0] sm:$0xff]  ;;  %v100_v29 = vld [vmem:[%s2655_s1 + $0xe8] sm:$0xff] }
  0x10   :  { %61 = vst [vmem:[#allocation2 + $0x48] sm:$0xff] %v60_v9  ;;  %v102_v30 = vld [vmem:[%s2655_s1 + $0xf0] sm:$0xff]  ;;  %v104_v31 = vld [vmem:[%s2655_s1 + $0xf8] sm:$0xff]  ;;  %v106_v32 = vld [vmem:[%s2655_s1 + $0x100] sm:$0xff] }
  0x11   :  { %63 = vst [vmem:[#allocation2 + $0x50] sm:$0xff] %v62_v10  ;;  %v108_v33 = vld [vmem:[%s2655_s1 + $0x108] sm:$0xff]  ;;  %v110_v34 = vld [vmem:[%s2655_s1 + $0x110] sm:$0xff]  ;;  %v112_v35 = vld [vmem:[%s2655_s1 + $0x118] sm:$0xff] }
  0x12   :  { %65 = vst [vmem:[#allocation2 + $0x58] sm:$0xff] %v64_v11  ;;  %v114_v36 = vld [vmem:[%s2655_s1 + $0x120] sm:$0xff]  ;;  %v116_v37 = vld [vmem:[%s2655_s1 + $0x128] sm:$0xff]  ;;  %v118_v38 = vld [vmem:[%s2655_s1 + $0x130] sm:$0xff] }
  0x13   :  { %67 = vst [vmem:[#allocation2 + $0x60] sm:$0xff] %v66_v12  ;;  %v120_v39 = vld [vmem:[%s2655_s1 + $0x138] sm:$0xff]  ;;  %v122_v40 = vld [vmem:[%s2655_s1 + $0x140] sm:$0xff]  ;;  %v124_v41 = vld [vmem:[%s2655_s1 + $0x148] sm:$0xff] }
  0x14   :  { %69 = vst [vmem:[#allocation2 + $0x68] sm:$0xff] %v68_v13  ;;  %v126_v42 = vld [vmem:[%s2655_s1 + $0x150] sm:$0xff]  ;;  %v128_v43 = vld [vmem:[%s2655_s1 + $0x158] sm:$0xff]  ;;  %v130_v44 = vld [vmem:[%s2655_s1 + $0x160] sm:$0xff] }
  0x15   :  { %71 = vst [vmem:[#allocation2 + $0x70] sm:$0xff] %v70_v14  ;;  %v132_v45 = vld [vmem:[%s2655_s1 + $0x168] sm:$0xff]  ;;  %v134_v46 = vld [vmem:[%s2655_s1 + $0x170] sm:$0xff]  ;;  %v136_v47 = vld [vmem:[%s2655_s1 + $0x178] sm:$0xff] }
  0x16   :  { %73 = vst [vmem:[#allocation2 + $0x78] sm:$0xff] %v72_v15  ;;  %v138_v48 = vld [vmem:[%s2655_s1 + $0x180] sm:$0xff]  ;;  %v140_v49 = vld [vmem:[%s2655_s1 + $0x188] sm:$0xff] }
  0x17   :  { %75 = vst [vmem:[#allocation2 + $0x80] sm:$0xff] %v74_v16 }
  0x18   :  { %77 = vst [vmem:[#allocation2 + $0x88] sm:$0xff] %v76_v17 }
  0x19   :  { %79 = vst [vmem:[#allocation2 + $0x90] sm:$0xff] %v78_v18 }
  0x1a   :  { %81 = vst [vmem:[#allocation2 + $0x98] sm:$0xff] %v80_v19 }
  0x1b   :  { %83 = vst [vmem:[#allocation2 + $0xa0] sm:$0xff] %v82_v20 }
  0x1c   :  { %85 = vst [vmem:[#allocation2 + $0xa8] sm:$0xff] %v84_v21 }
  0x1d   :  { %87 = vst [vmem:[#allocation2 + $0xb0] sm:$0xff] %v86_v22 }
  0x1e   :  { %89 = vst [vmem:[#allocation2 + $0xb8] sm:$0xff] %v88_v23 }
  0x1f   :  { %91 = vst [vmem:[#allocation2 + $0xc0] sm:$0xff] %v90_v24 }
  0x20   :  { %93 = vst [vmem:[#allocation2 + $0xc8] sm:$0xff] %v92_v25 }
  0x21   :  { %95 = vst [vmem:[#allocation2 + $0xd0] sm:$0xff] %v94_v26 }
  0x22   :  { %97 = vst [vmem:[#allocation2 + $0xd8] sm:$0xff] %v96_v27 }
  0x23   :  { %99 = vst [vmem:[#allocation2 + $0xe0] sm:$0xff] %v98_v28 }
  0x24   :  { %101 = vst [vmem:[#allocation2 + $0xe8] sm:$0xff] %v100_v29 }
  0x25   :  { %103 = vst [vmem:[#allocation2 + $0xf0] sm:$0xff] %v102_v30 }
  0x26   :  { %105 = vst [vmem:[#allocation2 + $0xf8] sm:$0xff] %v104_v31 }
  0x27   :  { %107 = vst [vmem:[#allocation2 + $0x100] sm:$0xff] %v106_v32 }
  0x28   :  { %109 = vst [vmem:[#allocation2 + $0x108] sm:$0xff] %v108_v33 }
  0x29   :  { %111 = vst [vmem:[#allocation2 + $0x110] sm:$0xff] %v110_v34 }
  0x2a   :  { %113 = vst [vmem:[#allocation2 + $0x118] sm:$0xff] %v112_v35 }
  0x2b   :  { %115 = vst [vmem:[#allocation2 + $0x120] sm:$0xff] %v114_v36 }
  0x2c   :  { %117 = vst [vmem:[#allocation2 + $0x128] sm:$0xff] %v116_v37 }
  0x2d   :  { %119 = vst [vmem:[#allocation2 + $0x130] sm:$0xff] %v118_v38 }
  0x2e   :  { %121 = vst [vmem:[#allocation2 + $0x138] sm:$0xff] %v120_v39 }
  0x2f   :  { %123 = vst [vmem:[#allocation2 + $0x140] sm:$0xff] %v122_v40 }
  0x30   :  { %125 = vst [vmem:[#allocation2 + $0x148] sm:$0xff] %v124_v41 }
  0x31   :  { %127 = vst [vmem:[#allocation2 + $0x150] sm:$0xff] %v126_v42 }
  0x32   :  { %129 = vst [vmem:[#allocation2 + $0x158] sm:$0xff] %v128_v43 }
  0x33   :  { %131 = vst [vmem:[#allocation2 + $0x160] sm:$0xff] %v130_v44 }
  0x34   :  { %133 = vst [vmem:[#allocation2 + $0x168] sm:$0xff] %v132_v45 }
  0x35   :  { %135 = vst [vmem:[#allocation2 + $0x170] sm:$0xff] %v134_v46 }
  0x36   :  { %137 = vst [vmem:[#allocation2 + $0x178] sm:$0xff] %v136_v47 }
  0x37   :  { %139 = vst [vmem:[#allocation2 + $0x180] sm:$0xff] %v138_v48 }
  0x38   :  { %141 = vst [vmem:[#allocation2 + $0x188] sm:$0xff] %v140_v49 }
  0x39   :  { %147 = vsyncadd [#allocation4], 6400  ;;  %v1325_v50 = vld [vmem:[%s2655_s1 + $0x190] sm:$0xff]  ;;  %v1326_v51 = vld [vmem:[%s2655_s1 + $0x198] sm:$0xff] }
  0x3a   :  { %161 = vst [vmem:[#allocation3] sm:$0xff] %v1325_v50  ;;  %v1327_v52 = vld [vmem:[%s2655_s1 + $0x1a0] sm:$0xff]  ;;  %v1328_v53 = vld [vmem:[%s2655_s1 + $0x1a8] sm:$0xff]  ;;  %v1329_v54 = vld [vmem:[%s2655_s1 + $0x1b0] sm:$0xff] }
  0x3b   :  { %163 = vst [vmem:[#allocation3 + $0x8] sm:$0xff] %v1326_v51  ;;  %v1330_v55 = vld [vmem:[%s2655_s1 + $0x1b8] sm:$0xff]  ;;  %v1331_v56 = vld [vmem:[%s2655_s1 + $0x1c0] sm:$0xff]  ;;  %v1332_v57 = vld [vmem:[%s2655_s1 + $0x1c8] sm:$0xff] }
  0x3c   :  { %165 = vst [vmem:[#allocation3 + $0x10] sm:$0xff] %v1327_v52  ;;  %v1333_v58 = vld [vmem:[%s2655_s1 + $0x1d0] sm:$0xff]  ;;  %v1334_v59 = vld [vmem:[%s2655_s1 + $0x1d8] sm:$0xff]  ;;  %v1335_v60 = vld [vmem:[%s2655_s1 + $0x1e0] sm:$0xff] }
  0x3d   :  { %167 = vst [vmem:[#allocation3 + $0x18] sm:$0xff] %v1328_v53  ;;  %v1336_v61 = vld [vmem:[%s2655_s1 + $0x1e8] sm:$0xff]  ;;  %v1337_v62 = vld [vmem:[%s2655_s1 + $0x1f0] sm:$0xff]  ;;  %v1338_v63 = vld [vmem:[%s2655_s1 + $0x1f8] sm:$0xff] }
  0x3e   :  { %169 = vst [vmem:[#allocation3 + $0x20] sm:$0xff] %v1329_v54  ;;  %v1339_v0 = vld [vmem:[%s2655_s1 + $0x200] sm:$0xff]  ;;  %v1340_v1 = vld [vmem:[%s2655_s1 + $0x208] sm:$0xff]  ;;  %v1341_v2 = vld [vmem:[%s2655_s1 + $0x210] sm:$0xff] }
  0x3f   :  { %171 = vst [vmem:[#allocation3 + $0x28] sm:$0xff] %v1330_v55  ;;  %v1342_v3 = vld [vmem:[%s2655_s1 + $0x218] sm:$0xff]  ;;  %v1343_v4 = vld [vmem:[%s2655_s1 + $0x220] sm:$0xff]  ;;  %v1344_v5 = vld [vmem:[%s2655_s1 + $0x228] sm:$0xff] }
  0x40   :  { %173 = vst [vmem:[#allocation3 + $0x30] sm:$0xff] %v1331_v56  ;;  %v1345_v6 = vld [vmem:[%s2655_s1 + $0x230] sm:$0xff]  ;;  %v1346_v7 = vld [vmem:[%s2655_s1 + $0x238] sm:$0xff]  ;;  %v1347_v8 = vld [vmem:[%s2655_s1 + $0x240] sm:$0xff] }
  0x41   :  { %175 = vst [vmem:[#allocation3 + $0x38] sm:$0xff] %v1332_v57  ;;  %v1348_v9 = vld [vmem:[%s2655_s1 + $0x248] sm:$0xff]  ;;  %v1349_v10 = vld [vmem:[%s2655_s1 + $0x250] sm:$0xff]  ;;  %v1350_v11 = vld [vmem:[%s2655_s1 + $0x258] sm:$0xff] }
  0x42   :  { %177 = vst [vmem:[#allocation3 + $0x40] sm:$0xff] %v1333_v58  ;;  %v1351_v12 = vld [vmem:[%s2655_s1 + $0x260] sm:$0xff]  ;;  %v1352_v13 = vld [vmem:[%s2655_s1 + $0x268] sm:$0xff]  ;;  %v1353_v14 = vld [vmem:[%s2655_s1 + $0x270] sm:$0xff] }
  0x43   :  { %179 = vst [vmem:[#allocation3 + $0x48] sm:$0xff] %v1334_v59  ;;  %v1354_v15 = vld [vmem:[%s2655_s1 + $0x278] sm:$0xff]  ;;  %v1355_v16 = vld [vmem:[%s2655_s1 + $0x280] sm:$0xff]  ;;  %v1356_v17 = vld [vmem:[%s2655_s1 + $0x288] sm:$0xff] }
  0x44   :  { %181 = vst [vmem:[#allocation3 + $0x50] sm:$0xff] %v1335_v60  ;;  %v1357_v18 = vld [vmem:[%s2655_s1 + $0x290] sm:$0xff]  ;;  %v1358_v19 = vld [vmem:[%s2655_s1 + $0x298] sm:$0xff]  ;;  %v1359_v20 = vld [vmem:[%s2655_s1 + $0x2a0] sm:$0xff] }
  0x45   :  { %183 = vst [vmem:[#allocation3 + $0x58] sm:$0xff] %v1336_v61  ;;  %v1360_v21 = vld [vmem:[%s2655_s1 + $0x2a8] sm:$0xff]  ;;  %v1361_v22 = vld [vmem:[%s2655_s1 + $0x2b0] sm:$0xff]  ;;  %v1362_v23 = vld [vmem:[%s2655_s1 + $0x2b8] sm:$0xff] }
  0x46   :  { %185 = vst [vmem:[#allocation3 + $0x60] sm:$0xff] %v1337_v62  ;;  %v1363_v24 = vld [vmem:[%s2655_s1 + $0x2c0] sm:$0xff]  ;;  %v1364_v25 = vld [vmem:[%s2655_s1 + $0x2c8] sm:$0xff]  ;;  %v1365_v26 = vld [vmem:[%s2655_s1 + $0x2d0] sm:$0xff] }
  0x47   :  { %187 = vst [vmem:[#allocation3 + $0x68] sm:$0xff] %v1338_v63  ;;  %v1366_v27 = vld [vmem:[%s2655_s1 + $0x2d8] sm:$0xff]  ;;  %v1367_v28 = vld [vmem:[%s2655_s1 + $0x2e0] sm:$0xff]  ;;  %v1368_v29 = vld [vmem:[%s2655_s1 + $0x2e8] sm:$0xff] }
  0x48   :  { %189 = vst [vmem:[#allocation3 + $0x70] sm:$0xff] %v1339_v0  ;;  %v1369_v30 = vld [vmem:[%s2655_s1 + $0x2f0] sm:$0xff]  ;;  %v1370_v31 = vld [vmem:[%s2655_s1 + $0x2f8] sm:$0xff]  ;;  %v1371_v32 = vld [vmem:[%s2655_s1 + $0x300] sm:$0xff] }
  0x49   :  { %191 = vst [vmem:[#allocation3 + $0x78] sm:$0xff] %v1340_v1  ;;  %v1372_v33 = vld [vmem:[%s2655_s1 + $0x308] sm:$0xff]  ;;  %v1373_v34 = vld [vmem:[%s2655_s1 + $0x310] sm:$0xff]  ;;  %v1374_v35 = vld [vmem:[%s2655_s1 + $0x318] sm:$0xff] }
  0x4a   :  { %193 = vst [vmem:[#allocation3 + $0x80] sm:$0xff] %v1341_v2 }
  0x4b   :  { %195 = vst [vmem:[#allocation3 + $0x88] sm:$0xff] %v1342_v3 }
  0x4c   :  { %197 = vst [vmem:[#allocation3 + $0x90] sm:$0xff] %v1343_v4 }
  0x4d   :  { %199 = vst [vmem:[#allocation3 + $0x98] sm:$0xff] %v1344_v5 }
  0x4e   :  { %201 = vst [vmem:[#allocation3 + $0xa0] sm:$0xff] %v1345_v6 }
  0x4f   :  { %203 = vst [vmem:[#allocation3 + $0xa8] sm:$0xff] %v1346_v7 }
  0x50   :  { %205 = vst [vmem:[#allocation3 + $0xb0] sm:$0xff] %v1347_v8 }
  0x51   :  { %207 = vst [vmem:[#allocation3 + $0xb8] sm:$0xff] %v1348_v9 }
  0x52   :  { %209 = vst [vmem:[#allocation3 + $0xc0] sm:$0xff] %v1349_v10 }
  0x53   :  { %211 = vst [vmem:[#allocation3 + $0xc8] sm:$0xff] %v1350_v11 }
  0x54   :  { %213 = vst [vmem:[#allocation3 + $0xd0] sm:$0xff] %v1351_v12 }
  0x55   :  { %215 = vst [vmem:[#allocation3 + $0xd8] sm:$0xff] %v1352_v13 }
  0x56   :  { %217 = vst [vmem:[#allocation3 + $0xe0] sm:$0xff] %v1353_v14 }
  0x57   :  { %219 = vst [vmem:[#allocation3 + $0xe8] sm:$0xff] %v1354_v15 }
  0x58   :  { %221 = vst [vmem:[#allocation3 + $0xf0] sm:$0xff] %v1355_v16 }
  0x59   :  { %223 = vst [vmem:[#allocation3 + $0xf8] sm:$0xff] %v1356_v17 }
  0x5a   :  { %225 = vst [vmem:[#allocation3 + $0x100] sm:$0xff] %v1357_v18 }
  0x5b   :  { %227 = vst [vmem:[#allocation3 + $0x108] sm:$0xff] %v1358_v19 }
  0x5c   :  { %229 = vst [vmem:[#allocation3 + $0x110] sm:$0xff] %v1359_v20 }
  0x5d   :  { %231 = vst [vmem:[#allocation3 + $0x118] sm:$0xff] %v1360_v21 }
  0x5e   :  { %233 = vst [vmem:[#allocation3 + $0x120] sm:$0xff] %v1361_v22 }
  0x5f   :  { %235 = vst [vmem:[#allocation3 + $0x128] sm:$0xff] %v1362_v23 }
  0x60   :  { %237 = vst [vmem:[#allocation3 + $0x130] sm:$0xff] %v1363_v24 }
  0x61   :  { %239 = vst [vmem:[#allocation3 + $0x138] sm:$0xff] %v1364_v25 }
  0x62   :  { %241 = vst [vmem:[#allocation3 + $0x140] sm:$0xff] %v1365_v26 }
  0x63   :  { %243 = vst [vmem:[#allocation3 + $0x148] sm:$0xff] %v1366_v27 }
  0x64   :  { %245 = vst [vmem:[#allocation3 + $0x150] sm:$0xff] %v1367_v28 }
  0x65   :  { %247 = vst [vmem:[#allocation3 + $0x158] sm:$0xff] %v1368_v29 }
  0x66   :  { %249 = vst [vmem:[#allocation3 + $0x160] sm:$0xff] %v1369_v30 }
  0x67   :  { %251 = vst [vmem:[#allocation3 + $0x168] sm:$0xff] %v1370_v31 }
  0x68   :  { %253 = vst [vmem:[#allocation3 + $0x170] sm:$0xff] %v1371_v32 }
  0x69   :  { %255 = vst [vmem:[#allocation3 + $0x178] sm:$0xff] %v1372_v33 }
  0x6a   :  { %257 = vst [vmem:[#allocation3 + $0x180] sm:$0xff] %v1373_v34 }
  0x6b   :  { %259 = vst [vmem:[#allocation3 + $0x188] sm:$0xff] %v1374_v35 }
  0x6c   :  { %265 = vsyncadd [#allocation4 + $0x1], 6400  ;;  %v2166_v36 = vmov 0.0   ;;  %v2168_v37 = vmov 0.0   ;;  %v2170_v38 = vmov 0.0   ;;  %v2172_v39 = vmov 0.0  }
  0x6d   :  { %v2174_v40 = vmov 0.0   ;;  %s2176_s26 = smov 0  }
  0x6e LB: > { %s2187_s27 = sshll.u32 %s1769_s26, 1  ;;  %s1769_s26 = sphi %s2176_s26, %s271_s26   ;;  %v1765_v40 = vphi %v2174_v40, %v2461_v40   ;;  %v1761_v39 = vphi %v2172_v39, %v2673_v39   ;;  %v1757_v38 = vphi %v2170_v38, %v2530_v38   ;;  %v1753_v37 = vphi %v2168_v37, %v2553_v37   ;;  %v1749_v36 = vphi %v2166_v36, %v2544_v36  }
  0x6f   : > { %1743 = dma.done.wait [#allocation4], 6400 }
  0x70   : > { %1744 = vsyncadd [#allocation4], 4294960896  ;;  %v2189_v41 = vmov 0.0   ;;  %s2201_s29 = smov 0  }
  0x71 LB: >> { %s1376_s30 = sshll.u32 %s1797_s29, 3  ;;  %v296_v42 = vstv %s1846_s13  ;;  %v2217_v43 = vstv %s1857_s0  ;;  %v2220_v44 = vstv %s1862_s22  ;;  %v2223_v45 = vstv %s1867_s25  ;;  %s286_s29 = sadd.s32 1, %s1797_s29   ;;  %s1797_s29 = sphi %s2201_s29, %s286_s29   ;;  %v1793_v40 = vphi %v1765_v40, %v2666_v40   ;;  %v1789_v39 = vphi %v1761_v39, %v2665_v39   ;;  %v1785_v38 = vphi %v1757_v38, %v2664_v38   ;;  %v1781_v37 = vphi %v1753_v37, %v2663_v37   ;;  %v1777_v36 = vphi %v1749_v36, %v2662_v36   ;;  %v1773_v41 = vphi %v2189_v41, %v2661_v41  }
  0x72   : >> { %s294_s4 = scalar_lea.vmem [#allocation2], %s1376_s30  ;;  %v299_v47 = vmul.f32 %v1793_v40, %v2217_v43  ;;  %v305_v48 = vmul.f32 %v1793_v40, %v2220_v44  ;;  %v311_v49 = vmul.f32 %v1789_v39, %v2223_v45  ;;  %v2231_v50 = vstv %s1872_s28  ;;  %p283_p0 = scmp.ge.s32.totalorder %s286_s29, 50  }
  0x73   : >> { %v2225_v46 = vld [vmem:[%s294_s4] sm:$0xff]   ;;  %v317_v54 = vmul.f32 %v1785_v38, %v2231_v50  ;;  %v2238_v55 = vstv %s1882_s6  ;;  %v2241_v58 = vstv %s1887_s9  ;;  %v2247_v63 = vstv %s1892_s12  ;;  %s2366_s8 = scalar_lea.vmem (%p283_p0), %s2656_s2, %s2187_s27  ;;  %s616_s10 = sadd.s32 (%p283_p0), 2, %s2187_s27 }
  0x74   : >> { %v297_v51 = vmul.f32 %v296_v42, %v2225_v46  ;;  %v301_v52 = vrot.slane %v299_v47, 7  ;;  %v307_v53 = vrot.slane %v305_v48, 6  ;;  %v313_v57 = vrot.slane %v311_v49, 7  ;;  %p1377_p1 = scmp.ge.s32.totalorder (%p283_p0), %s616_s10, 10 }
  0x75   : >> { %v350_v59 = vmul.f32 %v2217_v43, %v2225_v46  ;;  %v319_v61 = vrot.slane %v317_v54, 6  ;;  %v325_v62 = vmul.f32 %v1789_v39, %v2238_v55  ;;  %v331_v0 = vmul.f32 %v1785_v38, %v2241_v58 }
  0x76   : >> { %v303_v56 = vadd.f32 %v301_v52, %v297_v51  ;;  %v2251_v3 = vstv %s1897_s16  ;;  %v2254_v4 = vstv %s1877_s3  ;;  %v337_v5 = vmul.f32 %v1781_v37, %v2247_v63 }
  0x77   : >> { %v352_v1 = vrot.slane %v350_v59, 7  ;;  %v327_v8 = vrot.slane %v325_v62, 7  ;;  %v361_v9 = vmul.f32 %v1789_v39, %v2231_v50  ;;  %v333_v10 = vrot.slane %v331_v0, 6 }
  0x78   : >> { %v309_v60 = vadd.f32 %v307_v53, %v303_v56  ;;  %v343_v11 = vmul.f32 %v1777_v36, %v2251_v3  ;;  %v392_v15 = vmul.f32 %v2220_v44, %v2225_v46  ;;  %v339_v16 = vrot.slane %v337_v5, 7 }
  0x79   : >> { %v354_v6 = vadd.f32 %v352_v1, %v297_v51  ;;  %v363_v19 = vrot.slane %v361_v9, 6  ;;  %v372_v21 = vmul.f32 %v1789_v39, %v2241_v58  ;;  %v382_v31 = vmul.f32 %v1781_v37, %v2251_v3 }
  0x7a   : >> { %v315_v2 = vsub.f32 %v309_v60, %v313_v57  ;;  %v345_v23 = vrot.slane %v343_v11, 6  ;;  %v394_v25 = vrot.slane %v392_v15, 6  ;;  %vm614_vm0 = vcmask (%p283_p0), 8192  }
  0x7b   : >> { %v355_v13 = vadd.f32 %v354_v6, %v307_v53  ;;  %v374_v30 = vrot.slane %v372_v21, 6  ;;  %v384_v51 = vrot.slane %v382_v31, 6 }
  0x7c   : >> { %v321_v7 = vsub.f32 %v315_v2, %v319_v61  ;;  %v2270_v34 = vadd.f32 %v394_v25, %v354_v6 }
  0x7e   : >> { %v323_v12 = vmul.f32 %v2254_v4, %v321_v7  ;;  %v356_v14 = vmul.f32 %v321_v7, %v2223_v45  ;;  %v367_v20 = vmul.f32 %v2238_v55, %v321_v7  ;;  %v402_v26 = vmul.f32 %v321_v7, %v2231_v50 }
  0x7f   : >> { %v413_v48 = vmul.f32 %v2241_v58, %v321_v7 }
  0x80   : >> { %v329_v17 = vadd.f32 %v327_v8, %v323_v12  ;;  %v358_v18 = vrot.slane %v356_v14, 7  ;;  %v369_v29 = vrot.slane %v367_v20, 7  ;;  %v404_v36 = vrot.slane %v402_v26, 6 }
  0x81   : >> { %v415_v59 = vrot.slane %v413_v48, 6 }
  0x82   : >> { %v335_v22 = vadd.f32 %v333_v10, %v329_v17  ;;  %v360_v24 = vsub.f32 %v355_v13, %v358_v18 }
  0x84   : >> { %v341_v27 = vsub.f32 %v335_v22, %v339_v16  ;;  %v365_v28 = vsub.f32 %v360_v24, %v363_v19 }
  0x86   : >> { %v2267_v32 = vsub.f32 %v341_v27, %v345_v23  ;;  %v366_v33 = vmul.f32 %v365_v28, %v2254_v4  ;;  %v397_v35 = vmul.f32 %v365_v28, %v2223_v45  ;;  %v408_v47 = vmul.f32 %v365_v28, %v2238_v55 }
  0x87   : >> { %v438_v53 = vmul.f32 %v365_v28, %v2231_v50  ;;  %v449_v8 = vmul.f32 %v365_v28, %v2241_v58 }
  0x88   : >> { %v371_v38 = vadd.f32 %v369_v29, %v366_v33  ;;  %v377_v39 = vmul.f32 %v2267_v32, %v2247_v63  ;;  %v399_v40 = vrot.slane %v397_v35, 7  ;;  %v410_v57 = vrot.slane %v408_v47, 7 }
  0x89   : >> { %v423_v62 = vmul.f32 %v2267_v32, %v2251_v3  ;;  %v440_v1 = vrot.slane %v438_v53, 6  ;;  %v451_v17 = vrot.slane %v449_v8, 6 }
  0x8a   : >> { %v376_v49 = vadd.f32 %v374_v30, %v371_v38  ;;  %v379_v37 = vrot.slane %v377_v39, 7  ;;  %v401_v52 = vsub.f32 %v2270_v34, %v399_v40 }
  0x8b   : >> { %v425_v11 = vrot.slane %v423_v62, 6 }
  0x8c   : >> { %v381_v54 = vsub.f32 %v376_v49, %v379_v37  ;;  %v406_v56 = vsub.f32 %v401_v52, %v404_v36 }
  0x8e   : >> { %v386_v60 = vsub.f32 %v381_v54, %v384_v51  ;;  %v407_v61 = vmul.f32 %v406_v56, %v2254_v4  ;;  %v433_v0 = vmul.f32 %v406_v56, %v2223_v45  ;;  %v444_v7 = vmul.f32 %v406_v56, %v2238_v55 }
  0x8f   : >> { %v474_v13 = vmul.f32 %v406_v56, %v2231_v50  ;;  %v485_v27 = vmul.f32 %v406_v56, %v2241_v58 }
  0x90   : >> { %v412_v2 = vadd.f32 %v410_v57, %v407_v61  ;;  %v418_v5 = vmul.f32 %v386_v60, %v2247_v63  ;;  %v435_v6 = vrot.slane %v433_v0, 7  ;;  %v446_v16 = vrot.slane %v444_v7, 7 }
  0x91   : >> { %v459_v20 = vmul.f32 %v386_v60, %v2251_v3  ;;  %v476_v22 = vrot.slane %v474_v13, 6  ;;  %v487_v39 = vrot.slane %v485_v27, 6  ;;  %v348_v0 = vmul.f32 %v2267_v32, %v2267_v32 }
  0x92   : >> { %v417_v9 = vadd.f32 %v415_v59, %v412_v2  ;;  %v420_v10 = vrot.slane %v418_v5, 7  ;;  %v437_v12 = vsub.f32 %v2270_v34, %v435_v6 }
  0x93   : >> { %v461_v30 = vrot.slane %v459_v20, 6  ;;  %v349_v13 = vadd.f32 %v1773_v41, %v348_v0 }
  0x94   : >> { %v422_v14 = vsub.f32 %v417_v9, %v420_v10  ;;  %v442_v15 = vsub.f32 %v437_v12, %v440_v1  ;;  %v387_v1 = vmul.f32 %v386_v60, %v386_v60 }
  0x96   : >> { %v427_v18 = vsub.f32 %v422_v14, %v425_v11  ;;  %v443_v19 = vmul.f32 %v442_v15, %v2254_v4  ;;  %v469_v21 = vmul.f32 %v442_v15, %v2223_v45  ;;  %v480_v26 = vmul.f32 %v442_v15, %v2238_v55 }
  0x97   : >> { %v510_v33 = vmul.f32 %v442_v15, %v2231_v50  ;;  %v521_v56 = vmul.f32 %v442_v15, %v2241_v58  ;;  %v389_v14 = vrot.slane %v387_v1, 1 }
  0x98   : >> { %v448_v23 = vadd.f32 %v446_v16, %v443_v19  ;;  %v454_v24 = vmul.f32 %v427_v18, %v2247_v63  ;;  %v471_v25 = vrot.slane %v469_v21, 7  ;;  %v482_v38 = vrot.slane %v480_v26, 7 }
  0x99   : >> { %v495_v48 = vmul.f32 %v427_v18, %v2251_v3  ;;  %v512_v37 = vrot.slane %v510_v33, 6  ;;  %v523_v8 = vrot.slane %v521_v56, 6  ;;  %v428_v15 = vmul.f32 %v427_v18, %v427_v18 }
  0x9a   : >> { %v453_v28 = vadd.f32 %v451_v17, %v448_v23  ;;  %v456_v29 = vrot.slane %v454_v24, 7  ;;  %v473_v31 = vsub.f32 %v2270_v34, %v471_v25  ;;  %v391_v25 = vadd.f32 %v389_v14, %v349_v13 }
  0x9b   : >> { %v497_v61 = vrot.slane %v495_v48, 6  ;;  %v430_v26 = vrot.slane %v428_v15, 2 }
  0x9c   : >> { %v458_v35 = vsub.f32 %v453_v28, %v456_v29  ;;  %v478_v36 = vsub.f32 %v473_v31, %v476_v22 }
  0x9e   : >> { %v463_v40 = vsub.f32 %v458_v35, %v461_v30  ;;  %v479_v47 = vmul.f32 %v478_v36, %v2254_v4  ;;  %v505_v49 = vmul.f32 %v478_v36, %v2223_v45  ;;  %v516_v54 = vmul.f32 %v478_v36, %v2238_v55 }
  0x9f   : >> { %v546_v2 = vmul.f32 %v478_v36, %v2231_v50  ;;  %v557_v20 = vmul.f32 %v478_v36, %v2241_v58 }
  0xa0   : >> { %v484_v51 = vadd.f32 %v482_v38, %v479_v47  ;;  %v490_v52 = vmul.f32 %v463_v40, %v2247_v63  ;;  %v507_v53 = vrot.slane %v505_v49, 7  ;;  %v518_v7 = vrot.slane %v516_v54, 7 }
  0xa1   : >> { %v531_v11 = vmul.f32 %v463_v40, %v2251_v3  ;;  %v548_v16 = vrot.slane %v546_v2, 6  ;;  %v464_v27 = vmul.f32 %v463_v40, %v463_v40  ;;  %v559_v30 = vrot.slane %v557_v20, 6 }
  0xa2   : >> { %v489_v57 = vadd.f32 %v487_v39, %v484_v51  ;;  %v492_v59 = vrot.slane %v490_v52, 7  ;;  %v509_v62 = vsub.f32 %v2270_v34, %v507_v53  ;;  %v432_v39 = vadd.f32 %v430_v26, %v391_v25 }
  0xa3   : >> { %v533_v23 = vrot.slane %v531_v11, 6  ;;  %v466_v47 = vrot.slane %v464_v27, 3 }
  0xa4   : >> { %v494_v5 = vsub.f32 %v489_v57, %v492_v59  ;;  %v514_v6 = vsub.f32 %v509_v62, %v512_v37 }
  0xa5   : >> { %v468_v59 = vadd.f32 %v466_v47, %v432_v39 }
  0xa6   : >> { %v499_v9 = vsub.f32 %v494_v5, %v497_v61  ;;  %v515_v10 = vmul.f32 %v514_v6, %v2254_v4  ;;  %v541_v12 = vmul.f32 %v514_v6, %v2223_v45  ;;  %v552_v19 = vmul.f32 %v514_v6, %v2238_v55 }
  0xa7   : >> { %v582_v41 = vmul.f32 %v514_v6, %v2231_v50  ;;  %v593_v52 = vmul.f32 %v514_v6, %v2241_v58 }
  0xa8   : >> { %v520_v32 = vadd.f32 %v518_v7, %v515_v10  ;;  %v526_v60 = vmul.f32 %v499_v9, %v2247_v63  ;;  %v543_v17 = vrot.slane %v541_v12, 7  ;;  %v554_v29 = vrot.slane %v552_v19, 7 }
  0xa9   : >> { %v567_v35 = vmul.f32 %v499_v9, %v2251_v3  ;;  %v500_v48 = vmul.f32 %v499_v9, %v499_v9  ;;  %v584_v40 = vrot.slane %v582_v41, 6 }
  0xaa   : >> { %v525_v21 = vadd.f32 %v523_v8, %v520_v32  ;;  %v528_v22 = vrot.slane %v526_v60, 7  ;;  %v545_v24 = vsub.f32 %v2270_v34, %v543_v17  ;;  %v595_v8 = vrot.slane %v593_v52, 6 }
  0xab   : >> { %v569_v56 = vrot.slane %v567_v35, 6  ;;  %v502_v61 = vrot.slane %v500_v48, 4 }
  0xac   : >> { %v530_v18 = vsub.f32 %v525_v21, %v528_v22  ;;  %v2315_v38 = vsub.f32 %v545_v24, %v548_v16  }
  0xad   : >> { %v504_v9 = vadd.f32 %v502_v61, %v468_v59 }
  0xae   : >> { %v2657_v28 = vmov %v2315_v38  ;;  %v535_v31 = vsub.f32 %v530_v18, %v533_v23 }
  0xaf   : >> { %v551_v33 = vmul.f32 %v2657_v28, %v2254_v4  ;;  %v577_v36 = vmul.f32 %v2657_v28, %v2223_v45  ;;  %v588_v38 = vmul.f32 %v2657_v28, %v2238_v55 }
  0xb0   : >> { %v562_v37 = vmul.f32 %v535_v31, %v2247_v63  ;;  %v536_v62 = vmul.f32 %v535_v31, %v535_v31  ;;  %v603_v6 = vmul.f32 %v535_v31, %v2251_v3 }
  0xb1   : >> { %v556_v49 = vadd.f32 %v554_v29, %v551_v33  ;;  %v579_v51 = vrot.slane %v577_v36, 7  ;;  %v590_v2 = vrot.slane %v588_v38, 7  ;;  %v2664_v38 = vmov %v2657_v28 }
  0xb2   : >> { %v564_v54 = vrot.slane %v562_v37, 7  ;;  %v538_v10 = vrot.slane %v536_v62, 5  ;;  %v605_v15 = vrot.slane %v603_v6, 6 }
  0xb3   : >> { %v561_v53 = vadd.f32 %v559_v30, %v556_v49  ;;  %v581_v57 = vsub.f32 %v2270_v34, %v579_v51 }
  0xb4   : >> { %v540_v16 = vadd.f32 %v538_v10, %v504_v9 }
  0xb5   : >> { %v566_v0 = vsub.f32 %v561_v53, %v564_v54  ;;  %v2327_v39 = vsub.f32 %v581_v57, %v584_v40   ;;  %v2666_v40 = vmov %v2225_v46 }
  0xb7   : >> { %v2658_v1 = vmov %v2327_v39  ;;  %v2329_v36 = vsub.f32 %v566_v0, %v569_v56  }
  0xb8   : >> { %v587_v7 = vmul.f32 %v2658_v1, %v2254_v4  ;;  %v2665_v39 = vmov %v2658_v1 }
  0xb9   : >> { %v2659_v5 = vmov %v2329_v36 }
  0xba   : >> { %v572_v34 = vmul.f32 %v2659_v5, %v2659_v5  ;;  %v592_v11 = vadd.f32 %v590_v2, %v587_v7  ;;  %v598_v12 = vmul.f32 %v2659_v5, %v2247_v63  ;;  %v2662_v36 = vmov %v2659_v5 }
  0xbc   : >> { %v597_v13 = vadd.f32 %v595_v8, %v592_v11  ;;  %v600_v14 = vrot.slane %v598_v12, 7  ;;  %v574_v32 = vrot.slane %v572_v34, 6 }
  0xbe   : >> { %v602_v60 = vsub.f32 %v597_v13, %v600_v14  ;;  %v576_v19 = vadd.f32 %v574_v32, %v540_v16 }
  0xc0   : >> { %v2338_v37 = vsub.f32 %v602_v60, %v605_v15  }
  0xc2   : >> { %v2660_v17 = vmov %v2338_v37 }
  0xc3   : >> { %v608_v20 = vmul.f32 %v2660_v17, %v2660_v17  ;;  %v2663_v37 = vmov %v2660_v17 }
  0xc5   : >> { %v610_v21 = vrot.slane %v608_v20, 7  ;;  %285 = sbr.rel (!%p283_p0) target bundleno = 113 (0x71), region = 158 }
  0xc7   : >> { %v612_v22 = vadd.f32 %v610_v21, %v576_v19  }
  0xc9   : >> { %v2661_v41 = vmov %v612_v22  ;;  %615 = vst.msk [vmem:[%s2366_s8] sm:$0x1] (%p283_p0), %vm614_vm0, %v612_v22 }
  0xca   : > { %620 = sbr.rel (%p1377_p1) target bundleno = 259 (0x103), region = 65 }
  0xcb   : > { %s1379_s11 = smul.u32 (!%p1377_p1), 800, %s1769_s26 }
  0xcd   : > { %s2375_s17 = scalar_lea.vmem (!%p1377_p1), %s2655_s1, %s1379_s11 }
  0xcf   : > { %v1380_v23 = vld [vmem:[%s2375_s17 + $0x320] sm:$0xff]  ;;  %v1381_v24 = vld [vmem:[%s2375_s17 + $0x328] sm:$0xff]  ;;  %v1382_v25 = vld [vmem:[%s2375_s17 + $0x330] sm:$0xff] }
  0xd0   : > { %634 = vst [vmem:[#allocation2] sm:$0xff] %v1380_v23  ;;  %v1383_v26 = vld [vmem:[%s2375_s17 + $0x338] sm:$0xff]  ;;  %v1384_v27 = vld [vmem:[%s2375_s17 + $0x340] sm:$0xff]  ;;  %v1385_v41 = vld [vmem:[%s2375_s17 + $0x348] sm:$0xff] }
  0xd1   : > { %636 = vst [vmem:[#allocation2 + $0x8] sm:$0xff] %v1381_v24  ;;  %v1386_v18 = vld [vmem:[%s2375_s17 + $0x350] sm:$0xff]  ;;  %v1387_v29 = vld [vmem:[%s2375_s17 + $0x358] sm:$0xff]  ;;  %v1388_v30 = vld [vmem:[%s2375_s17 + $0x360] sm:$0xff] }
  0xd2   : > { %638 = vst [vmem:[#allocation2 + $0x10] sm:$0xff] %v1382_v25  ;;  %v1389_v31 = vld [vmem:[%s2375_s17 + $0x368] sm:$0xff]  ;;  %v1390_v33 = vld [vmem:[%s2375_s17 + $0x370] sm:$0xff]  ;;  %v1391_v35 = vld [vmem:[%s2375_s17 + $0x378] sm:$0xff] }
  0xd3   : > { %640 = vst [vmem:[#allocation2 + $0x18] sm:$0xff] %v1383_v26  ;;  %v1392_v36 = vld [vmem:[%s2375_s17 + $0x380] sm:$0xff]  ;;  %v1393_v39 = vld [vmem:[%s2375_s17 + $0x388] sm:$0xff]  ;;  %v1394_v47 = vld [vmem:[%s2375_s17 + $0x390] sm:$0xff] }
  0xd4   : > { %642 = vst [vmem:[#allocation2 + $0x20] sm:$0xff] %v1384_v27  ;;  %v1395_v48 = vld [vmem:[%s2375_s17 + $0x398] sm:$0xff]  ;;  %v1396_v40 = vld [vmem:[%s2375_s17 + $0x3a0] sm:$0xff]  ;;  %v1397_v49 = vld [vmem:[%s2375_s17 + $0x3a8] sm:$0xff] }
  0xd5   : > { %644 = vst [vmem:[#allocation2 + $0x28] sm:$0xff] %v1385_v41  ;;  %v1398_v37 = vld [vmem:[%s2375_s17 + $0x3b0] sm:$0xff]  ;;  %v1399_v51 = vld [vmem:[%s2375_s17 + $0x3b8] sm:$0xff]  ;;  %v1400_v38 = vld [vmem:[%s2375_s17 + $0x3c0] sm:$0xff] }
  0xd6   : > { %646 = vst [vmem:[#allocation2 + $0x30] sm:$0xff] %v1386_v18  ;;  %v1401_v52 = vld [vmem:[%s2375_s17 + $0x3c8] sm:$0xff]  ;;  %v1402_v53 = vld [vmem:[%s2375_s17 + $0x3d0] sm:$0xff]  ;;  %v1403_v54 = vld [vmem:[%s2375_s17 + $0x3d8] sm:$0xff] }
  0xd7   : > { %648 = vst [vmem:[#allocation2 + $0x38] sm:$0xff] %v1387_v29  ;;  %v1404_v56 = vld [vmem:[%s2375_s17 + $0x3e0] sm:$0xff]  ;;  %v1405_v57 = vld [vmem:[%s2375_s17 + $0x3e8] sm:$0xff]  ;;  %v1406_v59 = vld [vmem:[%s2375_s17 + $0x3f0] sm:$0xff] }
  0xd8   : > { %650 = vst [vmem:[#allocation2 + $0x40] sm:$0xff] %v1388_v30  ;;  %v1407_v61 = vld [vmem:[%s2375_s17 + $0x3f8] sm:$0xff]  ;;  %v1408_v62 = vld [vmem:[%s2375_s17 + $0x400] sm:$0xff]  ;;  %v1409_v0 = vld [vmem:[%s2375_s17 + $0x408] sm:$0xff] }
  0xd9   : > { %652 = vst [vmem:[#allocation2 + $0x48] sm:$0xff] %v1389_v31  ;;  %v1410_v2 = vld [vmem:[%s2375_s17 + $0x410] sm:$0xff]  ;;  %v1411_v7 = vld [vmem:[%s2375_s17 + $0x418] sm:$0xff]  ;;  %v1412_v8 = vld [vmem:[%s2375_s17 + $0x420] sm:$0xff] }
  0xda   : > { %654 = vst [vmem:[#allocation2 + $0x50] sm:$0xff] %v1390_v33  ;;  %v1413_v6 = vld [vmem:[%s2375_s17 + $0x428] sm:$0xff]  ;;  %v1414_v9 = vld [vmem:[%s2375_s17 + $0x430] sm:$0xff]  ;;  %v1415_v10 = vld [vmem:[%s2375_s17 + $0x438] sm:$0xff] }
  0xdb   : > { %656 = vst [vmem:[#allocation2 + $0x58] sm:$0xff] %v1391_v35  ;;  %v1416_v34 = vld [vmem:[%s2375_s17 + $0x440] sm:$0xff]  ;;  %v1417_v11 = vld [vmem:[%s2375_s17 + $0x448] sm:$0xff]  ;;  %v1418_v12 = vld [vmem:[%s2375_s17 + $0x450] sm:$0xff] }
  0xdc   : > { %658 = vst [vmem:[#allocation2 + $0x60] sm:$0xff] %v1392_v36  ;;  %v1419_v13 = vld [vmem:[%s2375_s17 + $0x458] sm:$0xff]  ;;  %v1420_v14 = vld [vmem:[%s2375_s17 + $0x460] sm:$0xff]  ;;  %v1421_v15 = vld [vmem:[%s2375_s17 + $0x468] sm:$0xff] }
  0xdd   : > { %660 = vst [vmem:[#allocation2 + $0x68] sm:$0xff] %v1393_v39  ;;  %v1422_v16 = vld [vmem:[%s2375_s17 + $0x470] sm:$0xff]  ;;  %v1423_v32 = vld [vmem:[%s2375_s17 + $0x478] sm:$0xff]  ;;  %v1424_v60 = vld [vmem:[%s2375_s17 + $0x480] sm:$0xff] }
  0xde   : > { %662 = vst [vmem:[#allocation2 + $0x70] sm:$0xff] %v1394_v47  ;;  %v1425_v19 = vld [vmem:[%s2375_s17 + $0x488] sm:$0xff]  ;;  %v1426_v20 = vld [vmem:[%s2375_s17 + $0x490] sm:$0xff]  ;;  %v1427_v21 = vld [vmem:[%s2375_s17 + $0x498] sm:$0xff] }
  0xdf   : > { %664 = vst [vmem:[#allocation2 + $0x78] sm:$0xff] %v1395_v48  ;;  %v1428_v22 = vld [vmem:[%s2375_s17 + $0x4a0] sm:$0xff]  ;;  %v1429_v23 = vld [vmem:[%s2375_s17 + $0x4a8] sm:$0xff] }
  0xe0   : > { %666 = vst [vmem:[#allocation2 + $0x80] sm:$0xff] %v1396_v40 }
  0xe1   : > { %668 = vst [vmem:[#allocation2 + $0x88] sm:$0xff] %v1397_v49 }
  0xe2   : > { %670 = vst [vmem:[#allocation2 + $0x90] sm:$0xff] %v1398_v37 }
  0xe3   : > { %672 = vst [vmem:[#allocation2 + $0x98] sm:$0xff] %v1399_v51 }
  0xe4   : > { %674 = vst [vmem:[#allocation2 + $0xa0] sm:$0xff] %v1400_v38 }
  0xe5   : > { %676 = vst [vmem:[#allocation2 + $0xa8] sm:$0xff] %v1401_v52 }
  0xe6   : > { %678 = vst [vmem:[#allocation2 + $0xb0] sm:$0xff] %v1402_v53 }
  0xe7   : > { %680 = vst [vmem:[#allocation2 + $0xb8] sm:$0xff] %v1403_v54 }
  0xe8   : > { %682 = vst [vmem:[#allocation2 + $0xc0] sm:$0xff] %v1404_v56 }
  0xe9   : > { %684 = vst [vmem:[#allocation2 + $0xc8] sm:$0xff] %v1405_v57 }
  0xea   : > { %686 = vst [vmem:[#allocation2 + $0xd0] sm:$0xff] %v1406_v59 }
  0xeb   : > { %688 = vst [vmem:[#allocation2 + $0xd8] sm:$0xff] %v1407_v61 }
  0xec   : > { %690 = vst [vmem:[#allocation2 + $0xe0] sm:$0xff] %v1408_v62 }
  0xed   : > { %692 = vst [vmem:[#allocation2 + $0xe8] sm:$0xff] %v1409_v0 }
  0xee   : > { %694 = vst [vmem:[#allocation2 + $0xf0] sm:$0xff] %v1410_v2 }
  0xef   : > { %696 = vst [vmem:[#allocation2 + $0xf8] sm:$0xff] %v1411_v7 }
  0xf0   : > { %698 = vst [vmem:[#allocation2 + $0x100] sm:$0xff] %v1412_v8 }
  0xf1   : > { %700 = vst [vmem:[#allocation2 + $0x108] sm:$0xff] %v1413_v6 }
  0xf2   : > { %702 = vst [vmem:[#allocation2 + $0x110] sm:$0xff] %v1414_v9 }
  0xf3   : > { %704 = vst [vmem:[#allocation2 + $0x118] sm:$0xff] %v1415_v10 }
  0xf4   : > { %706 = vst [vmem:[#allocation2 + $0x120] sm:$0xff] %v1416_v34 }
  0xf5   : > { %708 = vst [vmem:[#allocation2 + $0x128] sm:$0xff] %v1417_v11 }
  0xf6   : > { %710 = vst [vmem:[#allocation2 + $0x130] sm:$0xff] %v1418_v12 }
  0xf7   : > { %712 = vst [vmem:[#allocation2 + $0x138] sm:$0xff] %v1419_v13 }
  0xf8   : > { %714 = vst [vmem:[#allocation2 + $0x140] sm:$0xff] %v1420_v14 }
  0xf9   : > { %716 = vst [vmem:[#allocation2 + $0x148] sm:$0xff] %v1421_v15 }
  0xfa   : > { %718 = vst [vmem:[#allocation2 + $0x150] sm:$0xff] %v1422_v16 }
  0xfb   : > { %720 = vst [vmem:[#allocation2 + $0x158] sm:$0xff] %v1423_v32 }
  0xfc   : > { %722 = vst [vmem:[#allocation2 + $0x160] sm:$0xff] %v1424_v60 }
  0xfd   : > { %724 = vst [vmem:[#allocation2 + $0x168] sm:$0xff] %v1425_v19 }
  0xfe   : > { %726 = vst [vmem:[#allocation2 + $0x170] sm:$0xff] %v1426_v20 }
  0xff   : > { %728 = vst [vmem:[#allocation2 + $0x178] sm:$0xff] %v1427_v21 }
 0x100   : > { %730 = vst [vmem:[#allocation2 + $0x180] sm:$0xff] %v1428_v22 }
 0x101   : > { %732 = vst [vmem:[#allocation2 + $0x188] sm:$0xff] %v1429_v23 }
 0x102   : > { %738 = vsyncadd [#allocation4], 6400 }
 0x103 PF: > { %1745 = dma.done.wait [#allocation4 + $0x1], 6400 }
 0x104   : > { %1746 = vsyncadd [#allocation4 + $0x1], 4294960896  ;;  %v2427_v24 = vmov 0.0   ;;  %s2444_s18 = smov 0  }
 0x105 LB: >> { %s1430_s19 = sshll.u32 %s1825_s18, 3  ;;  %v760_v25 = vmul.f32 %v1821_v46, %v2217_v43  ;;  %v766_v26 = vmul.f32 %v1821_v46, %v2220_v44  ;;  %v772_v27 = vmul.f32 %v1817_v1, %v2223_v45  ;;  %v778_v30 = vmul.f32 %v1813_v28, %v2231_v50  ;;  %s747_s18 = sadd.s32 1, %s1825_s18   ;;  %s1825_s18 = sphi %s2444_s18, %s747_s18   ;;  %v1821_v46 = vphi %v2225_v46, %v2672_v46   ;;  %v1817_v1 = vphi %v2658_v1, %v2671_v1   ;;  %v1813_v28 = vphi %v2657_v28, %v2670_v28   ;;  %v1809_v17 = vphi %v2660_v17, %v2669_v17   ;;  %v1805_v5 = vphi %v2659_v5, %v2668_v5   ;;  %v1801_v24 = vphi %v2427_v24, %v2667_v24  }
 0x106   : >> { %s755_s20 = scalar_lea.vmem [#allocation3], %s1430_s19  ;;  %v786_v46 = vmul.f32 %v1817_v1, %v2238_v55  ;;  %v792_v48 = vmul.f32 %v1813_v28, %v2241_v58  ;;  %v798_v51 = vmul.f32 %v1809_v17, %v2247_v63  ;;  %v822_v53 = vmul.f32 %v1817_v1, %v2231_v50  ;;  %p744_p2 = scmp.ge.s32.totalorder %s747_s18, 50  }
 0x107   : >> { %v2461_v40 = vld [vmem:[%s755_s20] sm:$0xff]   ;;  %v762_v18 = vrot.slane %v760_v25, 7  ;;  %v768_v29 = vrot.slane %v766_v26, 6  ;;  %v774_v33 = vrot.slane %v772_v27, 7  ;;  %v780_v39 = vrot.slane %v778_v30, 6  ;;  %s1076_s21 = sadd.s32 (%p744_p2), 3, %s2187_s27 }
 0x108   : >> { %v758_v41 = vmul.f32 %v2461_v40, %v296_v42  ;;  %v811_v35 = vmul.f32 %v2461_v40, %v2217_v43  ;;  %v788_v52 = vrot.slane %v786_v46, 7  ;;  %v794_v54 = vrot.slane %v792_v48, 6  ;;  %p1433_p3 = scmp.ge.s32.totalorder (%p744_p2), %s1076_s21, 10 }
 0x109   : >> { %v804_v56 = vmul.f32 %v1805_v5, %v2251_v3  ;;  %v853_v62 = vmul.f32 %v2461_v40, %v2220_v44  ;;  %v800_v28 = vrot.slane %v798_v51, 7  ;;  %v824_v7 = vrot.slane %v822_v53, 6 }
 0x10a   : >> { %v764_v31 = vadd.f32 %v762_v18, %v758_v41  ;;  %v813_v47 = vrot.slane %v811_v35, 7  ;;  %v833_v6 = vmul.f32 %v1817_v1, %v2241_v58  ;;  %v843_v16 = vmul.f32 %v1809_v17, %v2251_v3 }
 0x10b   : >> { %v806_v10 = vrot.slane %v804_v56, 6  ;;  %v855_v5 = vrot.slane %v853_v62, 6 }
 0x10c   : >> { %v770_v36 = vadd.f32 %v768_v29, %v764_v31  ;;  %v815_v37 = vadd.f32 %v813_v47, %v758_v41  ;;  %v835_v15 = vrot.slane %v833_v6, 6  ;;  %v845_v41 = vrot.slane %v843_v16, 6 }
 0x10e   : >> { %v776_v49 = vsub.f32 %v770_v36, %v774_v33  ;;  %v816_v59 = vadd.f32 %v815_v37, %v768_v29  ;;  %v2485_v19 = vadd.f32 %v855_v5, %v815_v37 }
 0x110   : >> { %v782_v38 = vsub.f32 %v776_v49, %v780_v39 }
 0x112   : >> { %v784_v57 = vmul.f32 %v782_v38, %v2254_v4  ;;  %v817_v61 = vmul.f32 %v782_v38, %v2223_v45  ;;  %v828_v8 = vmul.f32 %v782_v38, %v2238_v55  ;;  %v863_v11 = vmul.f32 %v782_v38, %v2231_v50 }
 0x113   : >> { %v874_v26 = vmul.f32 %v782_v38, %v2241_v58 }
 0x114   : >> { %v790_v0 = vadd.f32 %v788_v52, %v784_v57  ;;  %v819_v2 = vrot.slane %v817_v61, 7  ;;  %v830_v14 = vrot.slane %v828_v8, 7  ;;  %v865_v20 = vrot.slane %v863_v11, 6 }
 0x115   : >> { %v876_v35 = vrot.slane %v874_v26, 6 }
 0x116   : >> { %v796_v9 = vadd.f32 %v794_v54, %v790_v0  ;;  %v821_v34 = vsub.f32 %v816_v59, %v819_v2 }
 0x118   : >> { %v802_v12 = vsub.f32 %v796_v9, %v800_v28  ;;  %v826_v13 = vsub.f32 %v821_v34, %v824_v7 }
 0x11a   : >> { %v2482_v32 = vsub.f32 %v802_v12, %v806_v10  ;;  %v827_v60 = vmul.f32 %v826_v13, %v2254_v4  ;;  %v858_v1 = vmul.f32 %v826_v13, %v2223_v45  ;;  %v869_v25 = vmul.f32 %v826_v13, %v2238_v55 }
 0x11b   : >> { %v899_v29 = vmul.f32 %v826_v13, %v2231_v50  ;;  %v910_v52 = vmul.f32 %v826_v13, %v2241_v58 }
 0x11c   : >> { %v832_v21 = vadd.f32 %v830_v14, %v827_v60  ;;  %v838_v22 = vmul.f32 %v2482_v32, %v2247_v63  ;;  %v860_v23 = vrot.slane %v858_v1, 7  ;;  %v871_v33 = vrot.slane %v869_v25, 7 }
 0x11d   : >> { %v884_v46 = vmul.f32 %v2482_v32, %v2251_v3  ;;  %v901_v48 = vrot.slane %v899_v29, 6  ;;  %v912_v0 = vrot.slane %v910_v52, 6 }
 0x11e   : >> { %v837_v27 = vadd.f32 %v835_v15, %v832_v21  ;;  %v840_v17 = vrot.slane %v838_v22, 7  ;;  %v862_v18 = vsub.f32 %v2485_v19, %v860_v23 }
 0x11f   : >> { %v886_v56 = vrot.slane %v884_v46, 6 }
 0x120   : >> { %v842_v30 = vsub.f32 %v837_v27, %v840_v17  ;;  %v867_v31 = vsub.f32 %v862_v18, %v865_v20 }
 0x122   : >> { %v847_v36 = vsub.f32 %v842_v30, %v845_v41  ;;  %v868_v39 = vmul.f32 %v867_v31, %v2254_v4  ;;  %v894_v47 = vmul.f32 %v867_v31, %v2223_v45  ;;  %v905_v38 = vmul.f32 %v867_v31, %v2238_v55 }
 0x123   : >> { %v935_v59 = vmul.f32 %v867_v31, %v2231_v50  ;;  %v946_v12 = vmul.f32 %v867_v31, %v2241_v58 }
 0x124   : >> { %v873_v49 = vadd.f32 %v871_v33, %v868_v39  ;;  %v879_v37 = vmul.f32 %v847_v36, %v2247_v63  ;;  %v896_v51 = vrot.slane %v894_v47, 7  ;;  %v907_v28 = vrot.slane %v905_v38, 7 }
 0x125   : >> { %v920_v8 = vmul.f32 %v847_v36, %v2251_v3  ;;  %v937_v9 = vrot.slane %v935_v59, 6  ;;  %v948_v22 = vrot.slane %v946_v12, 6  ;;  %v809_v47 = vmul.f32 %v2482_v32, %v2482_v32 }
 0x126   : >> { %v878_v53 = vadd.f32 %v876_v35, %v873_v49  ;;  %v881_v54 = vrot.slane %v879_v37, 7  ;;  %v898_v57 = vsub.f32 %v2485_v19, %v896_v51 }
 0x127   : >> { %v922_v15 = vrot.slane %v920_v8, 6  ;;  %v810_v59 = vadd.f32 %v1801_v24, %v809_v47 }
 0x128   : >> { %v883_v61 = vsub.f32 %v878_v53, %v881_v54  ;;  %v903_v62 = vsub.f32 %v898_v57, %v901_v48  ;;  %v848_v48 = vmul.f32 %v847_v36, %v847_v36 }
 0x12a   : >> { %v888_v2 = vsub.f32 %v883_v61, %v886_v56  ;;  %v904_v7 = vmul.f32 %v903_v62, %v2254_v4  ;;  %v930_v6 = vmul.f32 %v903_v62, %v2223_v45  ;;  %v941_v11 = vmul.f32 %v903_v62, %v2238_v55 }
 0x12b   : >> { %v971_v60 = vmul.f32 %v903_v62, %v2231_v50  ;;  %v982_v31 = vmul.f32 %v903_v62, %v2241_v58  ;;  %v850_v61 = vrot.slane %v848_v48, 1 }
 0x12c   : >> { %v909_v10 = vadd.f32 %v907_v28, %v904_v7  ;;  %v915_v34 = vmul.f32 %v888_v2, %v2247_v63  ;;  %v932_v5 = vrot.slane %v930_v6, 7  ;;  %v943_v21 = vrot.slane %v941_v11, 7 }
 0x12d   : >> { %v956_v26 = vmul.f32 %v888_v2, %v2251_v3  ;;  %v973_v17 = vrot.slane %v971_v60, 6  ;;  %v984_v52 = vrot.slane %v982_v31, 6  ;;  %v889_v62 = vmul.f32 %v888_v2, %v888_v2 }
 0x12e   : >> { %v914_v13 = vadd.f32 %v912_v0, %v909_v10  ;;  %v917_v14 = vrot.slane %v915_v34, 7  ;;  %v934_v16 = vsub.f32 %v2485_v19, %v932_v5  ;;  %v852_v5 = vadd.f32 %v850_v61, %v810_v59 }
 0x12f   : >> { %v958_v39 = vrot.slane %v956_v26, 6  ;;  %v891_v11 = vrot.slane %v889_v62, 2 }
 0x130   : >> { %v919_v1 = vsub.f32 %v914_v13, %v917_v14  ;;  %v939_v20 = vsub.f32 %v934_v16, %v937_v9 }
 0x132   : >> { %v924_v23 = vsub.f32 %v919_v1, %v922_v15  ;;  %v940_v25 = vmul.f32 %v939_v20, %v2254_v4  ;;  %v966_v27 = vmul.f32 %v939_v20, %v2223_v45  ;;  %v977_v30 = vmul.f32 %v939_v20, %v2238_v55 }
 0x133   : >> { %v1007_v49 = vmul.f32 %v939_v20, %v2231_v50  ;;  %v1018_v8 = vmul.f32 %v939_v20, %v2241_v58  ;;  %v893_v20 = vadd.f32 %v891_v11, %v852_v5 }
 0x134   : >> { %v945_v41 = vadd.f32 %v943_v21, %v940_v25  ;;  %v951_v18 = vmul.f32 %v924_v23, %v2247_v63  ;;  %v968_v29 = vrot.slane %v966_v27, 7  ;;  %v979_v38 = vrot.slane %v977_v30, 7 }
 0x135   : >> { %v992_v56 = vmul.f32 %v924_v23, %v2251_v3  ;;  %v1009_v28 = vrot.slane %v1007_v49, 6  ;;  %v925_v12 = vmul.f32 %v924_v23, %v924_v23  ;;  %v1020_v14 = vrot.slane %v1018_v8, 6 }
 0x136   : >> { %v950_v33 = vadd.f32 %v948_v22, %v945_v41  ;;  %v953_v35 = vrot.slane %v951_v18, 7  ;;  %v970_v46 = vsub.f32 %v2485_v19, %v968_v29 }
 0x137   : >> { %v994_v10 = vrot.slane %v992_v56, 6  ;;  %v927_v21 = vrot.slane %v925_v12, 3 }
 0x138   : >> { %v955_v37 = vsub.f32 %v950_v33, %v953_v35  ;;  %v975_v51 = vsub.f32 %v970_v46, %v973_v17 }
 0x139   : >> { %v929_v33 = vadd.f32 %v927_v21, %v893_v20 }
 0x13a   : >> { %v960_v53 = vsub.f32 %v955_v37, %v958_v39  ;;  %v976_v54 = vmul.f32 %v975_v51, %v2254_v4  ;;  %v1002_v57 = vmul.f32 %v975_v51, %v2223_v45  ;;  %v1013_v7 = vmul.f32 %v975_v51, %v2238_v55 }
 0x13b   : >> { %v1043_v24 = vmul.f32 %v975_v51, %v2231_v50  ;;  %v1054_v41 = vmul.f32 %v975_v51, %v2241_v58 }
 0x13c   : >> { %v981_v32 = vadd.f32 %v979_v38, %v976_v54  ;;  %v987_v36 = vmul.f32 %v960_v53, %v2247_v63  ;;  %v1004_v0 = vrot.slane %v1002_v57, 7  ;;  %v1015_v13 = vrot.slane %v1013_v7, 7 }
 0x13d   : >> { %v1028_v60 = vmul.f32 %v960_v53, %v2251_v3  ;;  %v961_v22 = vmul.f32 %v960_v53, %v960_v53  ;;  %v1045_v23 = vrot.slane %v1043_v24, 6  ;;  %v1056_v37 = vrot.slane %v1054_v41, 6 }
 0x13e   : >> { %v986_v6 = vadd.f32 %v984_v52, %v981_v32  ;;  %v989_v9 = vrot.slane %v987_v36, 7  ;;  %v1006_v34 = vsub.f32 %v2485_v19, %v1004_v0 }
 0x13f   : >> { %v1030_v30 = vrot.slane %v1028_v60, 6  ;;  %v963_v35 = vrot.slane %v961_v22, 4 }
 0x140   : >> { %v991_v2 = vsub.f32 %v986_v6, %v989_v9  ;;  %v2530_v38 = vsub.f32 %v1006_v34, %v1009_v28  }
 0x141   : >> { %v965_v52 = vadd.f32 %v963_v35, %v929_v33 }
 0x142   : >> { %v996_v15 = vsub.f32 %v991_v2, %v994_v10  ;;  %v1012_v16 = vmul.f32 %v2530_v38, %v2254_v4  ;;  %v1038_v1 = vmul.f32 %v2530_v38, %v2223_v45  ;;  %v1049_v17 = vmul.f32 %v2530_v38, %v2238_v55 }
 0x144   : >> { %v1017_v25 = vadd.f32 %v1015_v13, %v1012_v16  ;;  %v1023_v26 = vmul.f32 %v996_v15, %v2247_v63  ;;  %v1040_v27 = vrot.slane %v1038_v1, 7  ;;  %v997_v39 = vmul.f32 %v996_v15, %v996_v15 }
 0x145   : >> { %v1051_v48 = vrot.slane %v1049_v17, 7  ;;  %v1064_v51 = vmul.f32 %v996_v15, %v2251_v3 }
 0x146   : >> { %v1022_v18 = vadd.f32 %v1020_v14, %v1017_v25  ;;  %v1025_v29 = vrot.slane %v1023_v26, 7  ;;  %v1042_v31 = vsub.f32 %v2485_v19, %v1040_v27  ;;  %v999_v53 = vrot.slane %v997_v39, 5 }
 0x147   : >> { %v1066_v61 = vrot.slane %v1064_v51, 6 }
 0x148   : >> { %v1027_v46 = vsub.f32 %v1022_v18, %v1025_v29  ;;  %v2542_v47 = vsub.f32 %v1042_v31, %v1045_v23   ;;  %v1001_v62 = vadd.f32 %v999_v53, %v965_v52 }
 0x14a   : >> { %v2544_v36 = vsub.f32 %v1027_v46, %v1030_v30   ;;  %v1048_v49 = vmul.f32 %v2542_v47, %v2254_v4  ;;  %v2671_v1 = vmov %v2542_v47  ;;  %v2672_v46 = vmov %v2461_v40 }
 0x14c   : >> { %v1033_v19 = vmul.f32 %v2544_v36, %v2544_v36  ;;  %v1053_v54 = vadd.f32 %v1051_v48, %v1048_v49  ;;  %v1059_v56 = vmul.f32 %v2544_v36, %v2247_v63  ;;  %v2668_v5 = vmov %v2544_v36 }
 0x14e   : >> { %v1058_v57 = vadd.f32 %v1056_v37, %v1053_v54  ;;  %v1061_v59 = vrot.slane %v1059_v56, 7  ;;  %v1035_v28 = vrot.slane %v1033_v19, 6 }
 0x150   : >> { %v1063_v32 = vsub.f32 %v1058_v57, %v1061_v59  ;;  %v1037_v0 = vadd.f32 %v1035_v28, %v1001_v62  ;;  %v2670_v28 = vmov %v2530_v38 }
 0x152   : >> { %v2553_v37 = vsub.f32 %v1063_v32, %v1066_v61  }
 0x154   : >> { %v1069_v7 = vmul.f32 %v2553_v37, %v2553_v37  ;;  %v2669_v17 = vmov %v2553_v37 }
 0x156   : >> { %v1071_v8 = vrot.slane %v1069_v7, 7  ;;  %746 = sbr.rel (!%p744_p2) target bundleno = 261 (0x105), region = 169 }
 0x158   : >> { %v1073_v6 = vadd.f32 %v1071_v8, %v1037_v0  }
 0x15a   : >> { %v2667_v24 = vmov %v1073_v6  ;;  %1432 = vst.msk [vmem:[%s2366_s8 + $0x1] sm:$0x1] (%p744_p2), %vm614_vm0, %v1073_v6 }
 0x15b   : > { %1080 = sbr.rel (%p1433_p3) target bundleno = 404 (0x194), region = 95 }
 0x15c   : > { %s1435_s23 = smul.u32 (!%p1433_p3), 800, %s1769_s26 }
 0x15e   : > { %s2584_s30 = scalar_lea.vmem (!%p1433_p3), %s2655_s1, %s1435_s23 }
 0x160   : > { %v1436_v42 = vld [vmem:[%s2584_s30 + $0x4b0] sm:$0xff]  ;;  %v1437_v43 = vld [vmem:[%s2584_s30 + $0x4b8] sm:$0xff]  ;;  %v1438_v44 = vld [vmem:[%s2584_s30 + $0x4c0] sm:$0xff] }
 0x161   : > { %1094 = vst [vmem:[#allocation3] sm:$0xff] %v1436_v42  ;;  %v1439_v45 = vld [vmem:[%s2584_s30 + $0x4c8] sm:$0xff]  ;;  %v1440_v50 = vld [vmem:[%s2584_s30 + $0x4d0] sm:$0xff]  ;;  %v1441_v55 = vld [vmem:[%s2584_s30 + $0x4d8] sm:$0xff] }
 0x162   : > { %1096 = vst [vmem:[#allocation3 + $0x8] sm:$0xff] %v1437_v43  ;;  %v1442_v58 = vld [vmem:[%s2584_s30 + $0x4e0] sm:$0xff]  ;;  %v1443_v63 = vld [vmem:[%s2584_s30 + $0x4e8] sm:$0xff]  ;;  %v1444_v3 = vld [vmem:[%s2584_s30 + $0x4f0] sm:$0xff] }
 0x163   : > { %1098 = vst [vmem:[#allocation3 + $0x10] sm:$0xff] %v1438_v44  ;;  %v1445_v4 = vld [vmem:[%s2584_s30 + $0x4f8] sm:$0xff]  ;;  %v1446_v9 = vld [vmem:[%s2584_s30 + $0x500] sm:$0xff]  ;;  %v1447_v10 = vld [vmem:[%s2584_s30 + $0x508] sm:$0xff] }
 0x164   : > { %1100 = vst [vmem:[#allocation3 + $0x18] sm:$0xff] %v1439_v45  ;;  %v1448_v34 = vld [vmem:[%s2584_s30 + $0x510] sm:$0xff]  ;;  %v1449_v5 = vld [vmem:[%s2584_s30 + $0x518] sm:$0xff]  ;;  %v1450_v11 = vld [vmem:[%s2584_s30 + $0x520] sm:$0xff] }
 0x165   : > { %1102 = vst [vmem:[#allocation3 + $0x20] sm:$0xff] %v1440_v50  ;;  %v1451_v12 = vld [vmem:[%s2584_s30 + $0x528] sm:$0xff]  ;;  %v1452_v24 = vld [vmem:[%s2584_s30 + $0x530] sm:$0xff]  ;;  %v1453_v2 = vld [vmem:[%s2584_s30 + $0x538] sm:$0xff] }
 0x166   : > { %1104 = vst [vmem:[#allocation3 + $0x28] sm:$0xff] %v1441_v55  ;;  %v1454_v13 = vld [vmem:[%s2584_s30 + $0x540] sm:$0xff]  ;;  %v1455_v14 = vld [vmem:[%s2584_s30 + $0x548] sm:$0xff]  ;;  %v1456_v15 = vld [vmem:[%s2584_s30 + $0x550] sm:$0xff] }
 0x167   : > { %1106 = vst [vmem:[#allocation3 + $0x30] sm:$0xff] %v1442_v58  ;;  %v1457_v16 = vld [vmem:[%s2584_s30 + $0x558] sm:$0xff]  ;;  %v1458_v60 = vld [vmem:[%s2584_s30 + $0x560] sm:$0xff]  ;;  %v1459_v1 = vld [vmem:[%s2584_s30 + $0x568] sm:$0xff] }
 0x168   : > { %1108 = vst [vmem:[#allocation3 + $0x38] sm:$0xff] %v1443_v63  ;;  %v1460_v20 = vld [vmem:[%s2584_s30 + $0x570] sm:$0xff]  ;;  %v1461_v21 = vld [vmem:[%s2584_s30 + $0x578] sm:$0xff]  ;;  %v1462_v22 = vld [vmem:[%s2584_s30 + $0x580] sm:$0xff] }
 0x169   : > { %1110 = vst [vmem:[#allocation3 + $0x40] sm:$0xff] %v1444_v3  ;;  %v1463_v23 = vld [vmem:[%s2584_s30 + $0x588] sm:$0xff]  ;;  %v1464_v25 = vld [vmem:[%s2584_s30 + $0x590] sm:$0xff]  ;;  %v1465_v26 = vld [vmem:[%s2584_s30 + $0x598] sm:$0xff] }
 0x16a   : > { %1112 = vst [vmem:[#allocation3 + $0x48] sm:$0xff] %v1445_v4  ;;  %v1466_v27 = vld [vmem:[%s2584_s30 + $0x5a0] sm:$0xff]  ;;  %v1467_v17 = vld [vmem:[%s2584_s30 + $0x5a8] sm:$0xff]  ;;  %v1468_v41 = vld [vmem:[%s2584_s30 + $0x5b0] sm:$0xff] }
 0x16b   : > { %1114 = vst [vmem:[#allocation3 + $0x50] sm:$0xff] %v1446_v9  ;;  %v1469_v18 = vld [vmem:[%s2584_s30 + $0x5b8] sm:$0xff]  ;;  %v1470_v29 = vld [vmem:[%s2584_s30 + $0x5c0] sm:$0xff]  ;;  %v1471_v30 = vld [vmem:[%s2584_s30 + $0x5c8] sm:$0xff] }
 0x16c   : > { %1116 = vst [vmem:[#allocation3 + $0x58] sm:$0xff] %v1447_v10  ;;  %v1472_v31 = vld [vmem:[%s2584_s30 + $0x5d0] sm:$0xff]  ;;  %v1473_v33 = vld [vmem:[%s2584_s30 + $0x5d8] sm:$0xff]  ;;  %v1474_v35 = vld [vmem:[%s2584_s30 + $0x5e0] sm:$0xff] }
 0x16d   : > { %1118 = vst [vmem:[#allocation3 + $0x60] sm:$0xff] %v1448_v34  ;;  %v1475_v39 = vld [vmem:[%s2584_s30 + $0x5e8] sm:$0xff]  ;;  %v1476_v46 = vld [vmem:[%s2584_s30 + $0x5f0] sm:$0xff]  ;;  %v1477_v48 = vld [vmem:[%s2584_s30 + $0x5f8] sm:$0xff] }
 0x16e   : > { %1120 = vst [vmem:[#allocation3 + $0x68] sm:$0xff] %v1449_v5  ;;  %v1478_v49 = vld [vmem:[%s2584_s30 + $0x600] sm:$0xff]  ;;  %v1479_v51 = vld [vmem:[%s2584_s30 + $0x608] sm:$0xff]  ;;  %v1480_v52 = vld [vmem:[%s2584_s30 + $0x610] sm:$0xff] }
 0x16f   : > { %1122 = vst [vmem:[#allocation3 + $0x70] sm:$0xff] %v1450_v11  ;;  %v1481_v53 = vld [vmem:[%s2584_s30 + $0x618] sm:$0xff]  ;;  %v1482_v19 = vld [vmem:[%s2584_s30 + $0x620] sm:$0xff]  ;;  %v1483_v54 = vld [vmem:[%s2584_s30 + $0x628] sm:$0xff] }
 0x170   : > { %1124 = vst [vmem:[#allocation3 + $0x78] sm:$0xff] %v1451_v12  ;;  %v1484_v56 = vld [vmem:[%s2584_s30 + $0x630] sm:$0xff]  ;;  %v1485_v57 = vld [vmem:[%s2584_s30 + $0x638] sm:$0xff] }
 0x171   : > { %1126 = vst [vmem:[#allocation3 + $0x80] sm:$0xff] %v1452_v24 }
 0x172   : > { %1128 = vst [vmem:[#allocation3 + $0x88] sm:$0xff] %v1453_v2 }
 0x173   : > { %1130 = vst [vmem:[#allocation3 + $0x90] sm:$0xff] %v1454_v13 }
 0x174   : > { %1132 = vst [vmem:[#allocation3 + $0x98] sm:$0xff] %v1455_v14 }
 0x175   : > { %1134 = vst [vmem:[#allocation3 + $0xa0] sm:$0xff] %v1456_v15 }
 0x176   : > { %1136 = vst [vmem:[#allocation3 + $0xa8] sm:$0xff] %v1457_v16 }
 0x177   : > { %1138 = vst [vmem:[#allocation3 + $0xb0] sm:$0xff] %v1458_v60 }
 0x178   : > { %1140 = vst [vmem:[#allocation3 + $0xb8] sm:$0xff] %v1459_v1 }
 0x179   : > { %1142 = vst [vmem:[#allocation3 + $0xc0] sm:$0xff] %v1460_v20 }
 0x17a   : > { %1144 = vst [vmem:[#allocation3 + $0xc8] sm:$0xff] %v1461_v21 }
 0x17b   : > { %1146 = vst [vmem:[#allocation3 + $0xd0] sm:$0xff] %v1462_v22 }
 0x17c   : > { %1148 = vst [vmem:[#allocation3 + $0xd8] sm:$0xff] %v1463_v23 }
 0x17d   : > { %1150 = vst [vmem:[#allocation3 + $0xe0] sm:$0xff] %v1464_v25 }
 0x17e   : > { %1152 = vst [vmem:[#allocation3 + $0xe8] sm:$0xff] %v1465_v26 }
 0x17f   : > { %1154 = vst [vmem:[#allocation3 + $0xf0] sm:$0xff] %v1466_v27 }
 0x180   : > { %1156 = vst [vmem:[#allocation3 + $0xf8] sm:$0xff] %v1467_v17 }
 0x181   : > { %1158 = vst [vmem:[#allocation3 + $0x100] sm:$0xff] %v1468_v41 }
 0x182   : > { %1160 = vst [vmem:[#allocation3 + $0x108] sm:$0xff] %v1469_v18 }
 0x183   : > { %1162 = vst [vmem:[#allocation3 + $0x110] sm:$0xff] %v1470_v29 }
 0x184   : > { %1164 = vst [vmem:[#allocation3 + $0x118] sm:$0xff] %v1471_v30 }
 0x185   : > { %1166 = vst [vmem:[#allocation3 + $0x120] sm:$0xff] %v1472_v31 }
 0x186   : > { %1168 = vst [vmem:[#allocation3 + $0x128] sm:$0xff] %v1473_v33 }
 0x187   : > { %1170 = vst [vmem:[#allocation3 + $0x130] sm:$0xff] %v1474_v35 }
 0x188   : > { %1172 = vst [vmem:[#allocation3 + $0x138] sm:$0xff] %v1475_v39 }
 0x189   : > { %1174 = vst [vmem:[#allocation3 + $0x140] sm:$0xff] %v1476_v46 }
 0x18a   : > { %1176 = vst [vmem:[#allocation3 + $0x148] sm:$0xff] %v1477_v48 }
 0x18b   : > { %1178 = vst [vmem:[#allocation3 + $0x150] sm:$0xff] %v1478_v49 }
 0x18c   : > { %1180 = vst [vmem:[#allocation3 + $0x158] sm:$0xff] %v1479_v51 }
 0x18d   : > { %1182 = vst [vmem:[#allocation3 + $0x160] sm:$0xff] %v1480_v52 }
 0x18e   : > { %1184 = vst [vmem:[#allocation3 + $0x168] sm:$0xff] %v1481_v53 }
 0x18f   : > { %1186 = vst [vmem:[#allocation3 + $0x170] sm:$0xff] %v1482_v19 }
 0x190   : > { %1188 = vst [vmem:[#allocation3 + $0x178] sm:$0xff] %v1483_v54 }
 0x191   : > { %1190 = vst [vmem:[#allocation3 + $0x180] sm:$0xff] %v1484_v56 }
 0x192   : > { %1192 = vst [vmem:[#allocation3 + $0x188] sm:$0xff] %v1485_v57 }
 0x193   : > { %1198 = vsyncadd [#allocation4 + $0x1], 6400 }
 0x194 PF: > { %s271_s26 = sadd.s32 1, %s1769_s26   ;;  %v2673_v39 = vmov %v2542_v47 }
 0x195   : > { %p268_p4 = scmp.ge.s32.totalorder %s271_s26, 5  }
 0x197   :  { %270 = sbr.rel (!%p268_p4) target bundleno = 110 (0x6e), region = 180 }
 0x19c   :  { %1203 = vsyncpa [#allocation6], 1 }
 0x19d   :  { %1204 = vsyncmov [#allocation4] }
 0x1a0   :  { %s1205_s27 = vpop.sfrf %1204 }
 0x1a1   :  { %p1486_p5 = scmp.ne.s32.totalorder %s1205_s27, 0 }
 0x1a3   :  { %1209 = shalt.err (%p1486_p5)  }
 0x1a4   :  { %1211 = vsyncmov [#allocation4 + $0x1] }
 0x1a7   :  { %s1212_s4 = vpop.sfrf %1211 }
 0x1a8   :  { %p1487_p6 = scmp.ne.s32.totalorder %s1212_s4, 0 }
 0x1aa   :  { %1216 = shalt.err (%p1487_p6)  }

</bundles_post_ra>
